<compile_context>
chip_gen: v6e
topology: v6e:2x2x1
jax: 0.10.0
libtpu: 0.0.40
codegen_flags: <defaults>
</compile_context>

<pallas_src>
import functools

import jax
import jax.numpy as jnp
from jax import lax
from jax.experimental import pallas as pl
from jax.experimental.pallas import tpu as pltpu


def _round_up(x, m):
    return ((x + m - 1) // m) * m


def _row_chunk(n, target=8):
    """Largest divisor of n that is <= target (row-strip size)."""
    for c in range(min(target, n), 0, -1):
        if n % c == 0:
            return c
    return n


# ----------------------------------------------------------------------------
# Fused Pallas kernel: one batch element per grid step.
# ----------------------------------------------------------------------------
def _fused_kernel(*refs, H, W, Ho, Wo, stride, cin, chid, cout,
                  has_expand, use_res):
    """Fused InvertedResidual for one image.

    refs (has_expand=True):
      x_ref      (H, W, cin)      input image (true channels, batch squeezed)
      w_exp_ref  (cin, chid)      1x1 expand weights, BN1 scale folded, padded
      sh1_ref    (1, chid)        BN1 shift (padded)
      w_dw_ref   (9, chid)        3x3 depthwise taps, BN2 scale folded (padded)
      sh2_ref    (1, chid)        BN2 shift (padded)
      w_proj_ref (chid, cout)     1x1 project weights, BN3 scale folded
      sh3_ref    (1, cout)        BN3 shift
      o_ref      (Ho, Wo, cout)   output (batch squeezed)
      xpad_ref   (H+2, Wpp, chid) VMEM scratch: zero-padded expanded activation
    """
    if has_expand:
        (x_ref, w_exp_ref, sh1_ref, w_dw_ref, sh2_ref,
         w_proj_ref, sh3_ref, o_ref, xpad_ref) = refs
    else:
        (x_ref, w_dw_ref, sh2_ref,
         w_proj_ref, sh3_ref, o_ref, xpad_ref) = refs

    f32 = jnp.float32

    # Zero the padded scratch (halo ring + lane padding).  ~220 KB of VMEM
    # stores -> negligible, and keeps every grid step self-contained
    # (no cross-iteration scratch dependence -> megacore / multi-core safe).
    xpad_ref[...] = jnp.zeros_like(xpad_ref)

    # Loop-invariant weights: load once (1-2 vregs each), reuse in both loops.
    w_dw = w_dw_ref[...]          # (9, chid)    BN2 scale folded
    sh2 = sh2_ref[...]            # (1, chid)
    w_proj = w_proj_ref[...]      # (chid, cout) BN3 scale folded
    sh3 = sh3_ref[...]            # (1, cout)

    # ---- stage 1: 1x1 expand conv + BN + ReLU6 -> scratch interior ----------
    if has_expand:
        w_exp = w_exp_ref[...]    # (cin, chid)  BN1 scale folded
        sh1 = sh1_ref[...]        # (1, chid)
        Re = _row_chunk(H)

        def expand_body(c, carry):
            r0 = c * Re
            xr = x_ref[pl.ds(r0, Re), :, :].astype(f32)          # (Re, W, cin)
            h = jnp.dot(xr.reshape(Re * W, cin), w_exp,
                        preferred_element_type=f32)
            h = jnp.clip(h + sh1, 0.0, 6.0)
            xpad_ref[pl.ds(r0 + 1, Re), 1:W + 1, :] = h.reshape(Re, W, chid)
            return carry

        lax.fori_loop(0, H // Re, expand_body, 0)
    else:
        # expand_ratio == 1: no expand conv, copy x into the first `cin` lanes.
        xpad_ref[1:H + 1, 1:W + 1, 0:cin] = x_ref[...].astype(f32)

    # ---- stage 2+3: 3x3 depthwise + BN + ReLU6, 1x1 project + BN (+res) -----
    R = _row_chunk(Ho)

    def dwproj_body(c, carry):
        r0 = c * R                                    # output row offset
        acc = jnp.zeros((R, Wo, chid), f32)
        for ki in range(3):
            for kj in range(3):
                if stride == 1:
                    rows = pl.ds(r0 + ki, R)
                    cols = pl.ds(kj, Wo)
                else:
                    rows = pl.ds(r0 * stride + ki, R, stride)
                    cols = pl.ds(kj, Wo, stride)
                tap = xpad_ref[rows, cols, :]          # (R, Wo, chid)
                acc = acc + tap * w_dw[ki * 3 + kj, :]
        hdw = jnp.clip(acc + sh2, 0.0, 6.0)            # (R, Wo, chid)

        out = jnp.dot(hdw.reshape(R * Wo, chid), w_proj,
                      preferred_element_type=f32) + sh3          # (R*Wo, cout)
        if use_res:
            # residual re-uses the x block already in VMEM (stride==1 => Ho==H)
            xr = x_ref[pl.ds(r0, R), :, :].astype(f32)
            out = out + xr.reshape(R * Wo, cin)
        o_ref[pl.ds(r0, R), :, :] = out.reshape(R, Wo, cout).astype(o_ref.dtype)
        return carry

    lax.fori_loop(0, Ho // R, dwproj_body, 0)


# ----------------------------------------------------------------------------
# Wrapper around pallas_call (NHWC, fused block)
# ----------------------------------------------------------------------------
def fused_inverted_residual_nhwc(x_nhwc, params, cfg):
    """x_nhwc: (N, H, W, inp) float32 -> (N, Ho, Wo, oup) float32."""
    N, H, W, Cin = x_nhwc.shape
    stride = cfg["stride"]
    hidden = cfg["hidden"]
    oup = cfg["oup"]
    has_expand = cfg["expand_ratio"] != 1
    use_res = cfg["use_res"]

    Ho = (H + 2 - 3) // stride + 1
    Wo = (W + 2 - 3) // stride + 1
    chid = _round_up(hidden, 128)   # lane-dense hidden channels (VMEM only)
    Wpp = _round_up(W + 2, 8)       # sublane-aligned padded width

    args = [x_nhwc]
    in_specs = [pl.BlockSpec((None, H, W, Cin), lambda n: (n, 0, 0, 0))]

    # Fold BN scales into the conv weights; pad the hidden dim to `chid`.
    if has_expand:
        sc1, sh1 = params["bn1"]                                  # (1, hidden)
        w_exp = jnp.pad(params["w_exp"] * sc1, ((0, 0), (0, chid - hidden)))
        sh1p = jnp.pad(sh1, ((0, 0), (0, chid - hidden)))
        args += [w_exp, sh1p]
        in_specs += [pl.BlockSpec((Cin, chid), lambda n: (0, 0)),
                     pl.BlockSpec((1, chid), lambda n: (0, 0))]

    sc2, sh2 = params["bn2"]
    w_dw = jnp.pad(params["w_dw"] * sc2, ((0, 0), (0, chid - hidden)))
    sh2p = jnp.pad(sh2, ((0, 0), (0, chid - hidden)))

    sc3, sh3 = params["bn3"]
    w_proj = jnp.pad(params["w_proj"] * sc3, ((0, chid - hidden), (0, 0)))

    args += [w_dw, sh2p, w_proj, sh3]
    in_specs += [pl.BlockSpec((9, chid), lambda n: (0, 0)),
                 pl.BlockSpec((1, chid), lambda n: (0, 0)),
                 pl.BlockSpec((chid, oup), lambda n: (0, 0)),
                 pl.BlockSpec((1, oup), lambda n: (0, 0))]

    kernel = functools.partial(
        _fused_kernel, H=H, W=W, Ho=Ho, Wo=Wo, stride=stride,
        cin=Cin, chid=chid, cout=oup, has_expand=has_expand, use_res=use_res)

    return pl.pallas_call(
        kernel,
        out_shape=jax.ShapeDtypeStruct((N, Ho, Wo, oup), x_nhwc.dtype),
        grid=(N,),
        in_specs=in_specs,
        out_specs=pl.BlockSpec((None, Ho, Wo, oup), lambda n: (n, 0, 0, 0)),
        scratch_shapes=[pltpu.VMEM((H + 2, Wpp, chid), jnp.float32)],
        compiler_params=pltpu.CompilerParams(dimension_semantics=("parallel",)),
    )(*args)


# ----------------------------------------------------------------------------
# Parameters (inference-mode BN folded to scale/shift)
# ----------------------------------------------------------------------------
def _bn_fold(gamma, beta, mean, var, eps=1e-5):
    scale = gamma / jnp.sqrt(var + eps)
    shift = beta - mean * scale
    return scale[None, :], shift[None, :]


def init_inverted_residual(key, inp, oup, stride, expand_ratio):
    assert stride in (1, 2)
    hidden = int(round(inp * expand_ratio))
    ks = jax.random.split(key, 12)
    p = {}
    if expand_ratio != 1:
        # expand 1x1 conv: PyTorch (hidden, inp, 1, 1) -> stored as (inp, hidden)
        p["w_exp"] = jax.random.normal(ks[0], (inp, hidden), jnp.float32) * 0.1
        p["bn1"] = _bn_fold(
            1.0 + 0.1 * jax.random.normal(ks[1], (hidden,), jnp.float32),
            0.05 * jax.random.normal(ks[2], (hidden,), jnp.float32),
            0.05 * jax.random.normal(ks[3], (hidden,), jnp.float32),
            0.5 + jax.random.uniform(ks[4], (hidden,), jnp.float32),
        )
    # depthwise 3x3 conv: PyTorch (hidden, 1, 3, 3) -> stored as (9, hidden)
    w_dw_t = jax.random.normal(ks[5], (hidden, 1, 3, 3), jnp.float32) * 0.1
    p["w_dw_torch"] = w_dw_t
    p["w_dw"] = jnp.transpose(w_dw_t[:, 0], (1, 2, 0)).reshape(9, hidden)
    p["bn2"] = _bn_fold(
        1.0 + 0.1 * jax.random.normal(ks[6], (hidden,), jnp.float32),
        0.05 * jax.random.normal(ks[7], (hidden,), jnp.float32),
        0.05 * jax.random.normal(ks[8], (hidden,), jnp.float32),
        0.5 + jax.random.uniform(ks[9], (hidden,), jnp.float32),
    )
    # project 1x1 conv: PyTorch (oup, hidden, 1, 1) -> stored as (hidden, oup)
    p["w_proj"] = jax.random.normal(ks[10], (hidden, oup), jnp.float32) * 0.1
    p["bn3"] = _bn_fold(
        1.0 + 0.1 * jax.random.normal(ks[11], (oup,), jnp.float32),
        jnp.zeros((oup,), jnp.float32),
        jnp.zeros((oup,), jnp.float32),
        jnp.ones((oup,), jnp.float32),
    )
    cfg = dict(inp=inp, oup=oup, stride=stride, expand_ratio=expand_ratio,
               hidden=hidden, use_res=(stride == 1 and inp == oup))
    return p, cfg


def inverted_residual_forward(x_nchw, params, cfg):
    """Forward pass matching PyTorch InvertedResidual (input/output NCHW).

    NOTE: in a stacked model keep activations NHWC end-to-end and only
    transpose at the model boundaries; this wrapper exists to match the
    PyTorch layout of the spec.
    """
    x = jnp.transpose(x_nchw, (0, 2, 3, 1))          # NCHW -> NHWC
    out = fused_inverted_residual_nhwc(x, params, cfg)
    return jnp.transpose(out, (0, 3, 1, 2))          # NHWC -> NCHW


# ----------------------------------------------------------------------------
# Pure-JAX reference (for correctness check)
# ----------------------------------------------------------------------------
def reference_forward(x_nchw, params, cfg):
    x = jnp.transpose(x_nchw, (0, 2, 3, 1))
    h = x
    if cfg["expand_ratio"] != 1:
        sc, sh = params["bn1"]
        h = jnp.einsum("nhwc,cd->nhwd", h, params["w_exp"]) * sc[0] + sh[0]
        h = jnp.clip(h, 0.0, 6.0)
    w_dw = jnp.transpose(params["w_dw_torch"], (2, 3, 1, 0))  # (3,3,1,hidden)
    sc, sh = params["bn2"]
    h = lax.conv_general_dilated(
        h, w_dw, window_strides=(cfg["stride"], cfg["stride"]),
        padding=((1, 1), (1, 1)),
        dimension_numbers=("NHWC", "HWIO", "NHWC"),
        feature_group_count=cfg["hidden"])
    h = jnp.clip(h * sc[0] + sh[0], 0.0, 6.0)
    sc, sh = params["bn3"]
    out = jnp.einsum("nhwc,cd->nhwd", h, params["w_proj"]) * sc[0] + sh[0]
    if cfg["use_res"]:
        out = out + x
    return jnp.transpose(out, (0, 3, 1, 2))


# ----------------------------------------------------------------------------
if __name__ == "__main__":
    key = jax.random.PRNGKey(0)
    kx, kp = jax.random.split(key)

    # InvertedResidual(inp=8, oup=8, stride=1, expand_ratio=4) -> hidden=32,
    # residual path exercised.
    N, Cin, H, W = 2, 8, 16, 16
    x = jax.random.normal(kx, (N, Cin, H, W), jnp.float32)

    params, cfg = init_inverted_residual(kp, inp=8, oup=8, stride=1, expand_ratio=4)

    out = jax.block_until_ready(inverted_residual_forward(x, params, cfg))
    ref = jax.block_until_ready(reference_forward(x, params, cfg))

    assert out.shape == ref.shape == (N, 8, H, W), (out.shape, ref.shape)
    err = float(jnp.max(jnp.abs(out - ref)))
    assert err < 2e-4, err

    print("KERNEL_OK")
</pallas_src>

<mosaic_0001>
module attributes {stable_mosaic.version = 11 : i64} {
  func.func @_fused_kernel(%arg0: i32, %arg1: memref<1x16x16x8xf32, #tpu.memory_space<vmem>>, %arg2: memref<8x128xf32, #tpu.memory_space<vmem>>, %arg3: memref<1x128xf32, #tpu.memory_space<vmem>>, %arg4: memref<9x128xf32, #tpu.memory_space<vmem>>, %arg5: memref<1x128xf32, #tpu.memory_space<vmem>>, %arg6: memref<128x8xf32, #tpu.memory_space<vmem>>, %arg7: memref<1x8xf32, #tpu.memory_space<vmem>>, %arg8: memref<1x16x16x8xf32, #tpu.memory_space<vmem>>, %arg9: memref<18x24x128xf32, #tpu.memory_space<vmem>>) attributes {dimension_semantics = [#tpu.dimension_semantics<parallel>], iteration_bounds = array<i64: 2>, scalar_prefetch = 0 : i64, scratch_operands = 1 : i64, tpu.core_type = #tpu.core_type<tc>, window_params = [{transform_indices = @transform_0, window_bounds = array<i64: 1, 16, 16, 8>}, {pipeline_mode = #tpu.pipeline_mode<synchronous>, transform_indices = @transform_1, window_bounds = array<i64: 8, 128>}, {pipeline_mode = #tpu.pipeline_mode<synchronous>, transform_indices = @transform_2, window_bounds = array<i64: 1, 128>}, {pipeline_mode = #tpu.pipeline_mode<synchronous>, transform_indices = @transform_3, window_bounds = array<i64: 9, 128>}, {pipeline_mode = #tpu.pipeline_mode<synchronous>, transform_indices = @transform_4, window_bounds = array<i64: 1, 128>}, {pipeline_mode = #tpu.pipeline_mode<synchronous>, transform_indices = @transform_5, window_bounds = array<i64: 128, 8>}, {pipeline_mode = #tpu.pipeline_mode<synchronous>, transform_indices = @transform_6, window_bounds = array<i64: 1, 8>}, {transform_indices = @transform_7, window_bounds = array<i64: 1, 16, 16, 8>}]} {
    %cst = arith.constant 0.000000e+00 : f32
    %0 = vector.broadcast %cst : f32 to vector<18x24x128xf32>
    %c0 = arith.constant 0 : index
    %c0_0 = arith.constant 0 : index
    %c0_1 = arith.constant 0 : index
    %1 = vector.load %arg9[%c0, %c0_0, %c0_1] : memref<18x24x128xf32, #tpu.memory_space<vmem>>, vector<18x24x128xf32>
    tpu.vector_store %arg9[%c0, %c0_0, %c0_1], %0 {strides = array<i32>} : memref<18x24x128xf32, #tpu.memory_space<vmem>>, vector<18x24x128xf32>,
    %c0_2 = arith.constant 0 : index
    %c0_3 = arith.constant 0 : index
    %2 = vector.load %arg4[%c0_2, %c0_3] : memref<9x128xf32, #tpu.memory_space<vmem>>, vector<9x128xf32>
    %c0_4 = arith.constant 0 : index
    %c0_5 = arith.constant 0 : index
    %3 = vector.load %arg5[%c0_4, %c0_5] : memref<1x128xf32, #tpu.memory_space<vmem>>, vector<1x128xf32>
    %c0_6 = arith.constant 0 : index
    %c0_7 = arith.constant 0 : index
    %4 = vector.load %arg6[%c0_6, %c0_7] : memref<128x8xf32, #tpu.memory_space<vmem>>, vector<128x8xf32>
    %c0_8 = arith.constant 0 : index
    %c0_9 = arith.constant 0 : index
    %5 = vector.load %arg7[%c0_8, %c0_9] : memref<1x8xf32, #tpu.memory_space<vmem>>, vector<1x8xf32>
    %c0_10 = arith.constant 0 : index
    %c0_11 = arith.constant 0 : index
    %6 = vector.load %arg2[%c0_10, %c0_11] : memref<8x128xf32, #tpu.memory_space<vmem>>, vector<8x128xf32>
    %c0_12 = arith.constant 0 : index
    %c0_13 = arith.constant 0 : index
    %7 = vector.load %arg3[%c0_12, %c0_13] : memref<1x128xf32, #tpu.memory_space<vmem>>, vector<1x128xf32>
    %c0_i32 = arith.constant 0 : i32
    %c2_i32 = arith.constant 2 : i32
    %8 = arith.addi %c0_i32, %c2_i32 : i32
    %c1_i32 = arith.constant 1 : i32
    scf.for %arg10 = %c0_i32 to %8 step %c1_i32  : i32 {
      %c8_i32 = arith.constant 8 : i32
      %10 = arith.muli %arg10, %c8_i32 : i32
      %c0_19 = arith.constant 0 : index
      %11 = arith.index_cast %10 : i32 to index
      %c0_20 = arith.constant 0 : index
      %c0_21 = arith.constant 0 : index
      %12 = vector.load %arg1[%c0_19, %11, %c0_20, %c0_21] : memref<1x16x16x8xf32, #tpu.memory_space<vmem>>, vector<1x8x16x8xf32>
      %13 = vector.shape_cast %12 : vector<1x8x16x8xf32> to vector<8x16x8xf32>
      %14 = vector.shape_cast %13 : vector<8x16x8xf32> to vector<128x8xf32>
      %cst_22 = arith.constant dense<0.000000e+00> : vector<128x128xf32>
      %15 = tpu.matmul %14, %6, %cst_22 {dimension_numbers = #tpu.dot_dimension_numbers<[1], [0], [0], [1], [0, 0, 1, 1], [], []>} : vector<128x8xf32>, vector<8x128xf32>, vector<128x128xf32> -> vector<128x128xf32>
      %16 = vector.broadcast %7 : vector<1x128xf32> to vector<128x128xf32>
      %17 = arith.addf %15, %16 : vector<128x128xf32>
      %cst_23 = arith.constant 0.000000e+00 : f32
      %cst_24 = arith.constant 6.000000e+00 : f32
      %18 = vector.broadcast %cst_23 : f32 to vector<128x128xf32>
      %19 = arith.maximumf %18, %17 : vector<128x128xf32>
      %20 = vector.broadcast %cst_24 : f32 to vector<128x128xf32>
      %21 = arith.minimumf %20, %19 : vector<128x128xf32>
      %22 = vector.shape_cast %21 : vector<128x128xf32> to vector<8x16x128xf32>
      %c1_i32_25 = arith.constant 1 : i32
      %23 = arith.addi %10, %c1_i32_25 : i32
      %24 = arith.index_cast %23 : i32 to index
      %c1 = arith.constant 1 : index
      %c0_26 = arith.constant 0 : index
      %25 = vector.load %arg9[%24, %c1, %c0_26] : memref<18x24x128xf32, #tpu.memory_space<vmem>>, vector<8x16x128xf32>
      tpu.vector_store %arg9[%24, %c1, %c0_26], %22 {strides = array<i32>} : memref<18x24x128xf32, #tpu.memory_space<vmem>>, vector<8x16x128xf32>,
    }
    %c2_i32_14 = arith.constant 2 : i32
    %c0_i32_15 = arith.constant 0 : i32
    %c2_i32_16 = arith.constant 2 : i32
    %9 = arith.addi %c0_i32_15, %c2_i32_16 : i32
    %c1_i32_17 = arith.constant 1 : i32
    scf.for %arg10 = %c0_i32_15 to %9 step %c1_i32_17  : i32 {
      %c8_i32 = arith.constant 8 : i32
      %10 = arith.muli %arg10, %c8_i32 : i32
      %cst_19 = arith.constant 0.000000e+00 : f32
      %11 = vector.broadcast %cst_19 : f32 to vector<8x16x128xf32>
      %c0_i32_20 = arith.constant 0 : i32
      %12 = arith.addi %10, %c0_i32_20 : i32
      %13 = arith.index_cast %12 : i32 to index
      %c0_21 = arith.constant 0 : index
      %c0_22 = arith.constant 0 : index
      %14 = vector.load %arg9[%13, %c0_21, %c0_22] : memref<18x24x128xf32, #tpu.memory_space<vmem>>, vector<8x16x128xf32>
      %15 = vector.extract_strided_slice %2 {offsets = [0, 0], sizes = [1, 128], strides = [1, 1]} : vector<9x128xf32> to vector<1x128xf32>
      %16 = vector.shape_cast %15 : vector<1x128xf32> to vector<128xf32>
      %17 = vector.shape_cast %16 : vector<128xf32> to vector<1x1x128xf32>
      %18 = vector.broadcast %17 : vector<1x1x128xf32> to vector<8x16x128xf32>
      %19 = arith.mulf %14, %18 : vector<8x16x128xf32>
      %20 = arith.addf %11, %19 : vector<8x16x128xf32>
      %c0_i32_23 = arith.constant 0 : i32
      %21 = arith.addi %10, %c0_i32_23 : i32
      %22 = arith.index_cast %21 : i32 to index
      %c1 = arith.constant 1 : index
      %c0_24 = arith.constant 0 : index
      %23 = vector.load %arg9[%22, %c1, %c0_24] : memref<18x24x128xf32, #tpu.memory_space<vmem>>, vector<8x16x128xf32>
      %24 = vector.extract_strided_slice %2 {offsets = [1, 0], sizes = [1, 128], strides = [1, 1]} : vector<9x128xf32> to vector<1x128xf32>
      %25 = vector.shape_cast %24 : vector<1x128xf32> to vector<128xf32>
      %26 = vector.shape_cast %25 : vector<128xf32> to vector<1x1x128xf32>
      %27 = vector.broadcast %26 : vector<1x1x128xf32> to vector<8x16x128xf32>
      %28 = arith.mulf %23, %27 : vector<8x16x128xf32>
      %29 = arith.addf %20, %28 : vector<8x16x128xf32>
      %c0_i32_25 = arith.constant 0 : i32
      %30 = arith.addi %10, %c0_i32_25 : i32
      %31 = arith.index_cast %30 : i32 to index
      %c2 = arith.constant 2 : index
      %c0_26 = arith.constant 0 : index
      %32 = vector.load %arg9[%31, %c2, %c0_26] : memref<18x24x128xf32, #tpu.memory_space<vmem>>, vector<8x16x128xf32>
      %33 = vector.extract_strided_slice %2 {offsets = [2, 0], sizes = [1, 128], strides = [1, 1]} : vector<9x128xf32> to vector<1x128xf32>
      %34 = vector.shape_cast %33 : vector<1x128xf32> to vector<128xf32>
      %35 = vector.shape_cast %34 : vector<128xf32> to vector<1x1x128xf32>
      %36 = vector.broadcast %35 : vector<1x1x128xf32> to vector<8x16x128xf32>
      %37 = arith.mulf %32, %36 : vector<8x16x128xf32>
      %38 = arith.addf %29, %37 : vector<8x16x128xf32>
      %c1_i32_27 = arith.constant 1 : i32
      %39 = arith.addi %10, %c1_i32_27 : i32
      %40 = arith.index_cast %39 : i32 to index
      %c0_28 = arith.constant 0 : index
      %c0_29 = arith.constant 0 : index
      %41 = vector.load %arg9[%40, %c0_28, %c0_29] : memref<18x24x128xf32, #tpu.memory_space<vmem>>, vector<8x16x128xf32>
      %42 = vector.extract_strided_slice %2 {offsets = [3, 0], sizes = [1, 128], strides = [1, 1]} : vector<9x128xf32> to vector<1x128xf32>
      %43 = vector.shape_cast %42 : vector<1x128xf32> to vector<128xf32>
      %44 = vector.shape_cast %43 : vector<128xf32> to vector<1x1x128xf32>
      %45 = vector.broadcast %44 : vector<1x1x128xf32> to vector<8x16x128xf32>
      %46 = arith.mulf %41, %45 : vector<8x16x128xf32>
      %47 = arith.addf %38, %46 : vector<8x16x128xf32>
      %c1_i32_30 = arith.constant 1 : i32
      %48 = arith.addi %10, %c1_i32_30 : i32
      %49 = arith.index_cast %48 : i32 to index
      %c1_31 = arith.constant 1 : index
      %c0_32 = arith.constant 0 : index
      %50 = vector.load %arg9[%49, %c1_31, %c0_32] : memref<18x24x128xf32, #tpu.memory_space<vmem>>, vector<8x16x128xf32>
      %51 = vector.extract_strided_slice %2 {offsets = [4, 0], sizes = [1, 128], strides = [1, 1]} : vector<9x128xf32> to vector<1x128xf32>
      %52 = vector.shape_cast %51 : vector<1x128xf32> to vector<128xf32>
      %53 = vector.shape_cast %52 : vector<128xf32> to vector<1x1x128xf32>
      %54 = vector.broadcast %53 : vector<1x1x128xf32> to vector<8x16x128xf32>
      %55 = arith.mulf %50, %54 : vector<8x16x128xf32>
      %56 = arith.addf %47, %55 : vector<8x16x128xf32>
      %c1_i32_33 = arith.constant 1 : i32
      %57 = arith.addi %10, %c1_i32_33 : i32
      %58 = arith.index_cast %57 : i32 to index
      %c2_34 = arith.constant 2 : index
      %c0_35 = arith.constant 0 : index
      %59 = vector.load %arg9[%58, %c2_34, %c0_35] : memref<18x24x128xf32, #tpu.memory_space<vmem>>, vector<8x16x128xf32>
      %60 = vector.extract_strided_slice %2 {offsets = [5, 0], sizes = [1, 128], strides = [1, 1]} : vector<9x128xf32> to vector<1x128xf32>
      %61 = vector.shape_cast %60 : vector<1x128xf32> to vector<128xf32>
      %62 = vector.shape_cast %61 : vector<128xf32> to vector<1x1x128xf32>
      %63 = vector.broadcast %62 : vector<1x1x128xf32> to vector<8x16x128xf32>
      %64 = arith.mulf %59, %63 : vector<8x16x128xf32>
      %65 = arith.addf %56, %64 : vector<8x16x128xf32>
      %c2_i32_36 = arith.constant 2 : i32
      %66 = arith.addi %10, %c2_i32_36 : i32
      %67 = arith.index_cast %66 : i32 to index
      %c0_37 = arith.constant 0 : index
      %c0_38 = arith.constant 0 : index
      %68 = vector.load %arg9[%67, %c0_37, %c0_38] : memref<18x24x128xf32, #tpu.memory_space<vmem>>, vector<8x16x128xf32>
      %69 = vector.extract_strided_slice %2 {offsets = [6, 0], sizes = [1, 128], strides = [1, 1]} : vector<9x128xf32> to vector<1x128xf32>
      %70 = vector.shape_cast %69 : vector<1x128xf32> to vector<128xf32>
      %71 = vector.shape_cast %70 : vector<128xf32> to vector<1x1x128xf32>
      %72 = vector.broadcast %71 : vector<1x1x128xf32> to vector<8x16x128xf32>
      %73 = arith.mulf %68, %72 : vector<8x16x128xf32>
      %74 = arith.addf %65, %73 : vector<8x16x128xf32>
      %c2_i32_39 = arith.constant 2 : i32
      %75 = arith.addi %10, %c2_i32_39 : i32
      %76 = arith.index_cast %75 : i32 to index
      %c1_40 = arith.constant 1 : index
      %c0_41 = arith.constant 0 : index
      %77 = vector.load %arg9[%76, %c1_40, %c0_41] : memref<18x24x128xf32, #tpu.memory_space<vmem>>, vector<8x16x128xf32>
      %78 = vector.extract_strided_slice %2 {offsets = [7, 0], sizes = [1, 128], strides = [1, 1]} : vector<9x128xf32> to vector<1x128xf32>
      %79 = vector.shape_cast %78 : vector<1x128xf32> to vector<128xf32>
      %80 = vector.shape_cast %79 : vector<128xf32> to vector<1x1x128xf32>
      %81 = vector.broadcast %80 : vector<1x1x128xf32> to vector<8x16x128xf32>
      %82 = arith.mulf %77, %81 : vector<8x16x128xf32>
      %83 = arith.addf %74, %82 : vector<8x16x128xf32>
      %c2_i32_42 = arith.constant 2 : i32
      %84 = arith.addi %10, %c2_i32_42 : i32
      %85 = arith.index_cast %84 : i32 to index
      %c2_43 = arith.constant 2 : index
      %c0_44 = arith.constant 0 : index
      %86 = vector.load %arg9[%85, %c2_43, %c0_44] : memref<18x24x128xf32, #tpu.memory_space<vmem>>, vector<8x16x128xf32>
      %87 = vector.extract_strided_slice %2 {offsets = [8, 0], sizes = [1, 128], strides = [1, 1]} : vector<9x128xf32> to vector<1x128xf32>
      %88 = vector.shape_cast %87 : vector<1x128xf32> to vector<128xf32>
      %89 = vector.shape_cast %88 : vector<128xf32> to vector<1x1x128xf32>
      %90 = vector.broadcast %89 : vector<1x1x128xf32> to vector<8x16x128xf32>
      %91 = arith.mulf %86, %90 : vector<8x16x128xf32>
      %92 = arith.addf %83, %91 : vector<8x16x128xf32>
      %93 = vector.shape_cast %3 : vector<1x128xf32> to vector<1x1x128xf32>
      %94 = vector.broadcast %93 : vector<1x1x128xf32> to vector<8x16x128xf32>
      %95 = arith.addf %92, %94 : vector<8x16x128xf32>
      %cst_45 = arith.constant 0.000000e+00 : f32
      %cst_46 = arith.constant 6.000000e+00 : f32
      %96 = vector.broadcast %cst_45 : f32 to vector<8x16x128xf32>
      %97 = arith.maximumf %96, %95 : vector<8x16x128xf32>
      %98 = vector.broadcast %cst_46 : f32 to vector<8x16x128xf32>
      %99 = arith.minimumf %98, %97 : vector<8x16x128xf32>
      %100 = vector.shape_cast %99 : vector<8x16x128xf32> to vector<128x128xf32>
      %cst_47 = arith.constant dense<0.000000e+00> : vector<128x8xf32>
      %101 = tpu.matmul %100, %4, %cst_47 {dimension_numbers = #tpu.dot_dimension_numbers<[1], [0], [0], [1], [0, 0, 1, 1], [], []>} : vector<128x128xf32>, vector<128x8xf32>, vector<128x8xf32> -> vector<128x8xf32>
      %102 = vector.broadcast %5 : vector<1x8xf32> to vector<128x8xf32>
      %103 = arith.addf %101, %102 : vector<128x8xf32>
      %c0_48 = arith.constant 0 : index
      %104 = arith.index_cast %10 : i32 to index
      %c0_49 = arith.constant 0 : index
      %c0_50 = arith.constant 0 : index
      %105 = vector.load %arg1[%c0_48, %104, %c0_49, %c0_50] : memref<1x16x16x8xf32, #tpu.memory_space<vmem>>, vector<1x8x16x8xf32>
      %106 = vector.shape_cast %105 : vector<1x8x16x8xf32> to vector<8x16x8xf32>
      %107 = vector.shape_cast %106 : vector<8x16x8xf32> to vector<128x8xf32>
      %108 = arith.addf %103, %107 : vector<128x8xf32>
      %109 = vector.shape_cast %108 : vector<128x8xf32> to vector<8x16x8xf32>
      %c0_51 = arith.constant 0 : index
      %110 = arith.index_cast %10 : i32 to index
      %c0_52 = arith.constant 0 : index
      %c0_53 = arith.constant 0 : index
      %111 = vector.load %arg8[%c0_51, %110, %c0_52, %c0_53] : memref<1x16x16x8xf32, #tpu.memory_space<vmem>>, vector<1x8x16x8xf32>
      %112 = vector.shape_cast %111 : vector<1x8x16x8xf32> to vector<8x16x8xf32>
      %113 = vector.shape_cast %109 : vector<8x16x8xf32> to vector<1x8x16x8xf32>
      tpu.vector_store %arg8[%c0_51, %110, %c0_52, %c0_53], %113 {strides = array<i32>} : memref<1x16x16x8xf32, #tpu.memory_space<vmem>>, vector<1x8x16x8xf32>,
    }
    %c2_i32_18 = arith.constant 2 : i32
    return
  }
  func.func @transform_0(%arg0: i32) -> (i32, i32, i32, i32) {
    %c0_i32 = arith.constant 0 : i32
    %c0_i32_0 = arith.constant 0 : i32
    %c0_i32_1 = arith.constant 0 : i32
    %c0_i32_2 = arith.constant 0 : i32
    return %arg0, %c0_i32, %c0_i32_0, %c0_i32_1 : i32, i32, i32, i32
  }
  func.func @transform_1(%arg0: i32) -> (i32, i32) {
    %c0_i32 = arith.constant 0 : i32
    %c0_i32_0 = arith.constant 0 : i32
    %c0_i32_1 = arith.constant 0 : i32
    return %c0_i32, %c0_i32_0 : i32, i32
  }
  func.func @transform_2(%arg0: i32) -> (i32, i32) {
    %c0_i32 = arith.constant 0 : i32
    %c0_i32_0 = arith.constant 0 : i32
    %c0_i32_1 = arith.constant 0 : i32
    return %c0_i32, %c0_i32_0 : i32, i32
  }
  func.func @transform_3(%arg0: i32) -> (i32, i32) {
    %c0_i32 = arith.constant 0 : i32
    %c0_i32_0 = arith.constant 0 : i32
    %c0_i32_1 = arith.constant 0 : i32
    return %c0_i32, %c0_i32_0 : i32, i32
  }
  func.func @transform_4(%arg0: i32) -> (i32, i32) {
    %c0_i32 = arith.constant 0 : i32
    %c0_i32_0 = arith.constant 0 : i32
    %c0_i32_1 = arith.constant 0 : i32
    return %c0_i32, %c0_i32_0 : i32, i32
  }
  func.func @transform_5(%arg0: i32) -> (i32, i32) {
    %c0_i32 = arith.constant 0 : i32
    %c0_i32_0 = arith.constant 0 : i32
    %c0_i32_1 = arith.constant 0 : i32
    return %c0_i32, %c0_i32_0 : i32, i32
  }
  func.func @transform_6(%arg0: i32) -> (i32, i32) {
    %c0_i32 = arith.constant 0 : i32
    %c0_i32_0 = arith.constant 0 : i32
    %c0_i32_1 = arith.constant 0 : i32
    return %c0_i32, %c0_i32_0 : i32, i32
  }
  func.func @transform_7(%arg0: i32) -> (i32, i32, i32, i32) {
    %c0_i32 = arith.constant 0 : i32
    %c0_i32_0 = arith.constant 0 : i32
    %c0_i32_1 = arith.constant 0 : i32
    %c0_i32_2 = arith.constant 0 : i32
    return %arg0, %c0_i32, %c0_i32_0, %c0_i32_1 : i32, i32, i32, i32
  }
}

</mosaic_0001>

<bundles_post_ra>
// kernel: tpu_custom_call.1
= control target key start
LH: loop header
LB: loop body
LE: loop exit
PB: predicated region body
PF: predicated region fallthrough
CT: control target
= control target key end

     0   :  { %s1869_s24 = smov 0   ;;  %s2696_s0 = inlined_call_operand.vmem [shape: f32[2,16,16,8], index: 0, kind: input, shape index: {}]   ;;  %s2697_s1 = inlined_call_operand.vmem [shape: f32[8,128], index: 1, kind: input, shape index: {}]   ;;  %s2698_s2 = inlined_call_operand.vmem [shape: f32[1,128], index: 2, kind: input, shape index: {}]   ;;  %s2699_s3 = inlined_call_operand.vmem [shape: f32[9,128], index: 3, kind: input, shape index: {}]   ;;  %s2700_s4 = inlined_call_operand.vmem [shape: f32[1,128], index: 4, kind: input, shape index: {}]   ;;  %s2701_s5 = inlined_call_operand.vmem [shape: f32[128,8], index: 5, kind: input, shape index: {}]   ;;  %s2702_s6 = inlined_call_operand.vmem [shape: f32[1,8], index: 6, kind: input, shape index: {}]   ;;  %s2703_s7 = inlined_call_operand.vmem [shape: f32[2,16,16,8], index: 7, kind: output, shape index: {}]  }
   0x1 LB: > { %s1456_s25 = sadd.s32 4294967295, %s1818_s24   ;;  %p1460_p0 = scmp.ge.s32.totalorder %s1818_s24, 1  ;;  %s1818_s24 = sphi %s1869_s24, %s17_s24  }
   0x2   : > { %p237_p1 = scmp.lt.s32.totalorder %s1818_s24, 3 }
   0x4   : > { %p238_p2 = pnand %p1460_p0, %p237_p1 }
   0x5   : > { %p1879_p3 = scmp.lt.s32.totalorder (!%p238_p2), %s1456_s25, 1  ;;  %s2007_s12 = smov (!%p238_p2), 0  }
   0x6   : > { %241 = sbr.rel (%p238_p2) target bundleno = 574 (0x23e), region = 48 }
   0xb   : > { %v1886_v0 = vld [vmem:[%s2699_s3] sm:$0xff]  ;;  %v1891_v1 = vld [vmem:[%s2699_s3 + $0x8] ss:$0 sm:$0xff]  ;;  %v1828_v3 = vmov 0.0   ;;  %v1911_v6 = vld [vmem:[%s2701_s5 + $0x10] sm:$0xff]  ;;  %s2769_s25 = smov (!%p1879_p3, %s1456_s25), 1 }
   0xc   : > { %2726 = vst [vmem:[#allocation3_spill] sm:$0xff] %v1886_v0  ;;  %v1896_v2 = vld [vmem:[%s2701_s5] sm:$0xff]  ;;  %279 = vst [vmem:[#allocation2] sm:$0xff] %v1828_v3  ;;  %v1906_v5 = vld [vmem:[%s2701_s5 + $0x8] sm:$0xff]  ;;  %s1610_s30 = sshll.u32 %s2769_s25, 8 }
   0xd   : > { %2727 = vst [vmem:[#allocation4_spill] sm:$0xff] %v1896_v2  ;;  %280 = vst [vmem:[#allocation2 + $0x8] sm:$0xff] %v1828_v3  ;;  %v1901_v4 = vld [vmem:[%s2700_s4] ss:$0 sm:$0xff]  ;;  %v1920_v7 = vld [vmem:[%s2701_s5 + $0x18] sm:$0xff]  ;;  %s1965_s16 = scalar_lea.vmem %s2696_s0, %s1610_s30  ;;  %s1970_s18 = scalar_lea.vmem %s2703_s7, %s1610_s30 }
   0xe   : > { %281 = vst [vmem:[#allocation2 + $0x10] sm:$0xff] %v1828_v3  ;;  %282 = vst [vmem:[#allocation2 + $0x18] sm:$0xff] %v1828_v3  ;;  %v1925_v8 = vld [vmem:[%s2701_s5 + $0x20] sm:$0xff]  ;;  %v1930_v9 = vld [vmem:[%s2701_s5 + $0x28] sm:$0xff] }
   0xf   : > { %283 = vst [vmem:[#allocation2 + $0x20] sm:$0xff] %v1828_v3  ;;  %284 = vst [vmem:[#allocation2 + $0x28] sm:$0xff] %v1828_v3  ;;  %v1935_v10 = vld [vmem:[%s2701_s5 + $0x30] sm:$0xff]  ;;  %v1940_v11 = vld [vmem:[%s2701_s5 + $0x38] sm:$0xff] }
  0x10   : > { %285 = vst [vmem:[#allocation2 + $0x30] sm:$0xff] %v1828_v3  ;;  %286 = vst [vmem:[#allocation2 + $0x38] sm:$0xff] %v1828_v3  ;;  %v1945_v12 = vld [vmem:[%s2701_s5 + $0x40] sm:$0xff]  ;;  %v1950_v13 = vld [vmem:[%s2701_s5 + $0x48] sm:$0xff] }
  0x11   : > { %287 = vst [vmem:[#allocation2 + $0x40] sm:$0xff] %v1828_v3  ;;  %288 = vst [vmem:[#allocation2 + $0x48] sm:$0xff] %v1828_v3  ;;  %v1955_v14 = vld [vmem:[%s2701_s5 + $0x50] sm:$0xff]  ;;  %v1960_v15 = vld [vmem:[%s2701_s5 + $0x58] sm:$0xff] }
  0x12   : > { %289 = vst [vmem:[#allocation2 + $0x50] sm:$0xff] %v1828_v3  ;;  %290 = vst [vmem:[#allocation2 + $0x58] sm:$0xff] %v1828_v3  ;;  %v1975_v16 = vld [vmem:[%s2701_s5 + $0x60] sm:$0xff]  ;;  %v1980_v17 = vld [vmem:[%s2701_s5 + $0x68] sm:$0xff] }
  0x13   : > { %291 = vst [vmem:[#allocation2 + $0x60] sm:$0xff] %v1828_v3  ;;  %292 = vst [vmem:[#allocation2 + $0x68] sm:$0xff] %v1828_v3  ;;  %v1985_v18 = vld [vmem:[%s2701_s5 + $0x70] sm:$0xff]  ;;  %v1990_v19 = vld [vmem:[%s2701_s5 + $0x78] sm:$0xff] }
  0x14   : > { %293 = vst [vmem:[#allocation2 + $0x70] sm:$0xff] %v1828_v3  ;;  %294 = vst [vmem:[#allocation2 + $0x78] sm:$0xff] %v1828_v3  ;;  %v1995_v20 = vld [vmem:[%s2702_s6] ss:$0 sm:$0xff] }
  0x15   : > { %295 = vst [vmem:[#allocation2 + $0x80] sm:$0xff] %v1828_v3  ;;  %296 = vst [vmem:[#allocation2 + $0x88] sm:$0xff] %v1828_v3  ;;  %v2000_v21 = vld [vmem:[%s2697_s1] sm:$0xff] }
  0x16   : > { %297 = vst [vmem:[#allocation2 + $0x90] sm:$0xff] %v1828_v3  ;;  %298 = vst [vmem:[#allocation2 + $0x98] sm:$0xff] %v1828_v3  ;;  %v2005_v22 = vld [vmem:[%s2698_s2] ss:$0 sm:$0xff] }
  0x17   : > { %299 = vst [vmem:[#allocation2 + $0xa0] sm:$0xff] %v1828_v3  ;;  %300 = vst [vmem:[#allocation2 + $0xa8] sm:$0xff] %v1828_v3 }
  0x18   : > { %301 = vst [vmem:[#allocation2 + $0xb0] sm:$0xff] %v1828_v3  ;;  %302 = vst [vmem:[#allocation2 + $0xb8] sm:$0xff] %v1828_v3 }
  0x19   : > { %303 = vst [vmem:[#allocation2 + $0xc0] sm:$0xff] %v1828_v3  ;;  %304 = vst [vmem:[#allocation2 + $0xc8] sm:$0xff] %v1828_v3 }
  0x1a   : > { %305 = vst [vmem:[#allocation2 + $0xd0] sm:$0xff] %v1828_v3  ;;  %306 = vst [vmem:[#allocation2 + $0xd8] sm:$0xff] %v1828_v3 }
  0x1b   : > { %307 = vst [vmem:[#allocation2 + $0xe0] sm:$0xff] %v1828_v3  ;;  %308 = vst [vmem:[#allocation2 + $0xe8] sm:$0xff] %v1828_v3 }
  0x1c   : > { %309 = vst [vmem:[#allocation2 + $0xf0] sm:$0xff] %v1828_v3  ;;  %310 = vst [vmem:[#allocation2 + $0xf8] sm:$0xff] %v1828_v3 }
  0x1d   : > { %311 = vst [vmem:[#allocation2 + $0x100] sm:$0xff] %v1828_v3  ;;  %312 = vst [vmem:[#allocation2 + $0x108] sm:$0xff] %v1828_v3 }
  0x1e   : > { %313 = vst [vmem:[#allocation2 + $0x110] sm:$0xff] %v1828_v3  ;;  %314 = vst [vmem:[#allocation2 + $0x118] sm:$0xff] %v1828_v3 }
  0x1f   : > { %315 = vst [vmem:[#allocation2 + $0x120] sm:$0xff] %v1828_v3  ;;  %316 = vst [vmem:[#allocation2 + $0x128] sm:$0xff] %v1828_v3 }
  0x20   : > { %317 = vst [vmem:[#allocation2 + $0x130] sm:$0xff] %v1828_v3  ;;  %318 = vst [vmem:[#allocation2 + $0x138] sm:$0xff] %v1828_v3 }
  0x21   : > { %319 = vst [vmem:[#allocation2 + $0x140] sm:$0xff] %v1828_v3  ;;  %320 = vst [vmem:[#allocation2 + $0x148] sm:$0xff] %v1828_v3 }
  0x22   : > { %321 = vst [vmem:[#allocation2 + $0x150] sm:$0xff] %v1828_v3  ;;  %322 = vst [vmem:[#allocation2 + $0x158] sm:$0xff] %v1828_v3 }
  0x23   : > { %323 = vst [vmem:[#allocation2 + $0x160] sm:$0xff] %v1828_v3  ;;  %324 = vst [vmem:[#allocation2 + $0x168] sm:$0xff] %v1828_v3 }
  0x24   : > { %325 = vst [vmem:[#allocation2 + $0x170] sm:$0xff] %v1828_v3  ;;  %326 = vst [vmem:[#allocation2 + $0x178] sm:$0xff] %v1828_v3 }
  0x25   : > { %327 = vst [vmem:[#allocation2 + $0x180] sm:$0xff] %v1828_v3  ;;  %328 = vst [vmem:[#allocation2 + $0x188] sm:$0xff] %v1828_v3 }
  0x26   : > { %329 = vst [vmem:[#allocation2 + $0x190] sm:$0xff] %v1828_v3  ;;  %330 = vst [vmem:[#allocation2 + $0x198] sm:$0xff] %v1828_v3 }
  0x27   : > { %331 = vst [vmem:[#allocation2 + $0x1a0] sm:$0xff] %v1828_v3  ;;  %332 = vst [vmem:[#allocation2 + $0x1a8] sm:$0xff] %v1828_v3 }
  0x28   : > { %2728 = vst [vmem:[#allocation5_spill] sm:$0xff] %v1906_v5  ;;  %2729 = vst [vmem:[#allocation6_spill] sm:$0xff] %v1911_v6 }
  0x29   : > { %2730 = vst [vmem:[#allocation7_spill] sm:$0xff] %v1920_v7  ;;  %2731 = vst [vmem:[#allocation8_spill] sm:$0xff] %v1925_v8 }
  0x2a   : > { %2732 = vst [vmem:[#allocation9_spill] sm:$0xff] %v1930_v9  ;;  %2733 = vst [vmem:[#allocation10_spill] sm:$0xff] %v1935_v10 }
  0x2b   : > { %2734 = vst [vmem:[#allocation11_spill] sm:$0xff] %v1940_v11  ;;  %2735 = vst [vmem:[#allocation12_spill] sm:$0xff] %v1945_v12 }
  0x2c   : > { %2736 = vst [vmem:[#allocation13_spill] sm:$0xff] %v1950_v13  ;;  %2737 = vst [vmem:[#allocation14_spill] sm:$0xff] %v1955_v14 }
  0x2d   : > { %2738 = vst [vmem:[#allocation15_spill] sm:$0xff] %v1960_v15  ;;  %2739 = vst [vmem:[#allocation16_spill] sm:$0xff] %v1975_v16 }
  0x2e   : > { %2740 = vst [vmem:[#allocation17_spill] sm:$0xff] %v1980_v17  ;;  %2741 = vst [vmem:[#allocation18_spill] sm:$0xff] %v1985_v18 }
  0x2f   : > { %2742 = vst [vmem:[#allocation19_spill] sm:$0xff] %v1990_v19  ;;  %2743 = vst [vmem:[#allocation20_spill] sm:$0xff] %v1995_v20 }
  0x30 LB: >> { %1663 = vmatprep.subr.mxu0 %v2000_v21  ;;  %1745 = vmatprep.subr.mxu1 %v2000_v21  ;;  %s1612_s13 = sshll.u32 %s1822_s12, 7  ;;  %vm386_vm0 = vcmask 64512   ;;  %s1485_s15 = smul.u32 192, %s1822_s12  ;;  %s1822_s12 = sphi %s2007_s12, %s360_s12  }
  0x31   : >> { %1664 = vmatpush3.msra.mxu0 %v2000_v21  ;;  %1746 = vmatpush3.msra.mxu1 %v2000_v21  ;;  %s363_s14 = scalar_lea.vmem %s1965_s16, %s1612_s13  ;;  %s360_s12 = sadd.s32 1, %s1822_s12  }
  0x32   : >> { %v364_v23 = vld [vmem:[%s363_s14] sm:$0xff]  ;;  %v365_v25 = vld [vmem:[%s363_s14 + $0x8] sm:$0xff]  ;;  %v366_v27 = vld [vmem:[%s363_s14 + $0x10] sm:$0xff]  ;;  %s2041_s25 = scalar_lea.vmem [#allocation2], %s1485_s15  ;;  %p357_p4 = scmp.ge.s32.totalorder %s360_s12, 2  }
  0x33   : >> { %v372_v24 = vld [vmem:[%s363_s14 + $0x40] sm:$0xff]  ;;  %1665 = vmatprep.mubr.msk.f32.mxu0 %vm386_vm0, %v364_v23  ;;  %v373_v26 = vld [vmem:[%s363_s14 + $0x48] sm:$0xff]  ;;  %v374_v28 = vld [vmem:[%s363_s14 + $0x50] sm:$0xff]  ;;  %s2072_s17 = smov (%p357_p4), 0  }
  0x34   : >> { %1677 = vmatprep.mubr.msk.f32.mxu1 %vm386_vm0, %v372_v24  ;;  %1666 = vmatmul.mubr.msk.f32.vlgmr.msra.gmra.mxu0 %vm386_vm0, %v365_v25  ;;  %v367_v29 = vld [vmem:[%s363_s14 + $0x18] sm:$0xff]  ;;  %v368_v31 = vld [vmem:[%s363_s14 + $0x20] sm:$0xff]  ;;  %v369_v33 = vld [vmem:[%s363_s14 + $0x28] sm:$0xff] }
  0x35   : >> { %1678 = vmatmul.mubr.msk.f32.vlgmr.msra.gmra.mxu1 %vm386_vm0, %v373_v26  ;;  %1668 = vmatprep.mubr.msk.f32.mxu0 %vm386_vm0, %v366_v27  ;;  %v375_v30 = vld [vmem:[%s363_s14 + $0x58] sm:$0xff]  ;;  %v376_v32 = vld [vmem:[%s363_s14 + $0x60] sm:$0xff]  ;;  %v377_v34 = vld [vmem:[%s363_s14 + $0x68] sm:$0xff] }
  0x36   : >> { %1680 = vmatprep.mubr.msk.f32.mxu1 %vm386_vm0, %v374_v28  ;;  %v370_v35 = vld [vmem:[%s363_s14 + $0x30] sm:$0xff]  ;;  %v371_v37 = vld [vmem:[%s363_s14 + $0x38] sm:$0xff] }
  0x37   : >> { %v378_v36 = vld [vmem:[%s363_s14 + $0x70] sm:$0xff]  ;;  %v379_v38 = vld [vmem:[%s363_s14 + $0x78] sm:$0xff] }
  0x38   : >> { %1669 = vmatmul.mubr.msk.f32.gmra.mxu0 %vm386_vm0, %v367_v29 }
  0x39   : >> { %1681 = vmatmul.mubr.msk.f32.gmra.mxu1 %vm386_vm0, %v375_v30  ;;  %1671 = vmatprep.mubr.msk.f32.mxu0 %vm386_vm0, %v368_v31 }
  0x3a   : >> { %1683 = vmatprep.mubr.msk.f32.mxu1 %vm386_vm0, %v376_v32 }
  0x3c   : >> { %1672 = vmatmul.mubr.msk.f32.gmra.mxu0 %vm386_vm0, %v369_v33 }
  0x3d   : >> { %1684 = vmatmul.mubr.msk.f32.gmra.mxu1 %vm386_vm0, %v377_v34  ;;  %1674 = vmatprep.mubr.msk.f32.mxu0 %vm386_vm0, %v370_v35 }
  0x3e   : >> { %1686 = vmatprep.mubr.msk.f32.mxu1 %vm386_vm0, %v378_v36 }
  0x40   : >> { %1675 = vmatmul.mubr.msk.f32.gmra.mxu0 %vm386_vm0, %v371_v37 }
  0x41   : >> { %1687 = vmatmul.mubr.msk.f32.gmra.mxu1 %vm386_vm0, %v379_v38 }
  0xf4   : >> { %v1667_v39 = vpop.f32.mrf.mxu0 }
  0xf5   : >> { %v1679_v40 = vpop.f32.mrf.mxu1  ;;  %v507_v41 = vadd.f32 %v1667_v39, %v2005_v22 }
  0xf6   : >> { %v547_v42 = vadd.f32 %v1679_v40, %v2005_v22  ;;  %v501_v43 = vpop.f32.mrf.mxu0 }
  0xf7   : >> { %v541_v44 = vpop.f32.mrf.mxu1  ;;  %v581_v45 = vmax.f32 %v507_v41, 0.0  ;;  %v502_v47 = vadd.f32 %v2005_v22, %v501_v43 }
  0xf8   : >> { %v589_v46 = vmax.f32 %v547_v42, 0.0  ;;  %v542_v48 = vadd.f32 %v2005_v22, %v541_v44  ;;  %v1670_v49 = vpop.f32.mrf.mxu0 }
  0xf9   : >> { %v1682_v50 = vpop.f32.mrf.mxu1  ;;  %v597_v51 = vmin.f32 %v581_v45, 6.0  ;;  %v580_v53 = vmax.f32 %v502_v47, 0.0  ;;  %v517_v55 = vadd.f32 %v1670_v49, %v2005_v22 }
  0xfa   : >> { %v605_v52 = vmin.f32 %v589_v46, 6.0  ;;  %v588_v54 = vmax.f32 %v542_v48, 0.0  ;;  %v557_v56 = vadd.f32 %v1682_v50, %v2005_v22  ;;  %v511_v57 = vpop.f32.mrf.mxu0 }
  0xfb   : >> { %v551_v58 = vpop.f32.mrf.mxu1  ;;  %1487 = vst [vmem:[%s2041_s25 + $0x21] sm:$0xff] %v597_v51  ;;  %v596_v59 = vmin.f32 %v580_v53, 6.0  ;;  %v512_v61 = vadd.f32 %v2005_v22, %v511_v57  ;;  %v583_v63 = vmax.f32 %v517_v55, 0.0 }
  0xfc   : >> { %1495 = vst [vmem:[%s2041_s25 + $0x81] sm:$0xff] %v605_v52  ;;  %v604_v60 = vmin.f32 %v588_v54, 6.0  ;;  %v552_v62 = vadd.f32 %v2005_v22, %v551_v58  ;;  %v591_v3 = vmax.f32 %v557_v56, 0.0  ;;  %v1673_v23 = vpop.f32.mrf.mxu0 }
  0xfd   : >> { %v1685_v24 = vpop.f32.mrf.mxu1  ;;  %1486 = vst [vmem:[%s2041_s25 + $0x19] sm:$0xff] %v596_v59  ;;  %v582_v25 = vmax.f32 %v512_v61, 0.0  ;;  %v527_v27 = vadd.f32 %v1673_v23, %v2005_v22  ;;  %v599_v29 = vmin.f32 %v583_v63, 6.0 }
  0xfe   : >> { %1494 = vst [vmem:[%s2041_s25 + $0x79] sm:$0xff] %v604_v60  ;;  %v590_v26 = vmax.f32 %v552_v62, 0.0  ;;  %v567_v28 = vadd.f32 %v1685_v24, %v2005_v22  ;;  %v607_v30 = vmin.f32 %v591_v3, 6.0  ;;  %v521_v31 = vpop.f32.mrf.mxu0 }
  0xff   : >> { %v561_v32 = vpop.f32.mrf.mxu1  ;;  %v598_v33 = vmin.f32 %v582_v25, 6.0  ;;  %v585_v35 = vmax.f32 %v527_v27, 0.0  ;;  %1489 = vst [vmem:[%s2041_s25 + $0x39] sm:$0xff] %v599_v29  ;;  %v522_v37 = vadd.f32 %v2005_v22, %v521_v31 }
 0x100   : >> { %v606_v34 = vmin.f32 %v590_v26, 6.0  ;;  %v593_v36 = vmax.f32 %v567_v28, 0.0  ;;  %1497 = vst [vmem:[%s2041_s25 + $0x99] sm:$0xff] %v607_v30  ;;  %v562_v38 = vadd.f32 %v2005_v22, %v561_v32  ;;  %v1676_v39 = vpop.f32.mrf.mxu0 }
 0x101   : >> { %v1688_v40 = vpop.f32.mrf.mxu1  ;;  %1488 = vst [vmem:[%s2041_s25 + $0x31] sm:$0xff] %v598_v33  ;;  %v601_v41 = vmin.f32 %v585_v35, 6.0  ;;  %v537_v43 = vadd.f32 %v1676_v39, %v2005_v22  ;;  %v584_v45 = vmax.f32 %v522_v37, 0.0 }
 0x102   : >> { %1496 = vst [vmem:[%s2041_s25 + $0x91] sm:$0xff] %v606_v34  ;;  %v609_v42 = vmin.f32 %v593_v36, 6.0  ;;  %v577_v44 = vadd.f32 %v1688_v40, %v2005_v22  ;;  %v592_v46 = vmax.f32 %v562_v38, 0.0  ;;  %v531_v47 = vpop.f32.mrf.mxu0 }
 0x103   : >> { %v571_v48 = vpop.f32.mrf.mxu1  ;;  %1491 = vst [vmem:[%s2041_s25 + $0x51] sm:$0xff] %v601_v41  ;;  %v587_v49 = vmax.f32 %v537_v43, 0.0  ;;  %v532_v51 = vadd.f32 %v2005_v22, %v531_v47  ;;  %v600_v53 = vmin.f32 %v584_v45, 6.0 }
 0x104   : >> { %1499 = vst [vmem:[%s2041_s25 + $0xb1] sm:$0xff] %v609_v42  ;;  %v595_v50 = vmax.f32 %v577_v44, 0.0  ;;  %v572_v52 = vadd.f32 %v2005_v22, %v571_v48  ;;  %v608_v54 = vmin.f32 %v592_v46, 6.0 }
 0x105   : >> { %v603_v55 = vmin.f32 %v587_v49, 6.0  ;;  %v586_v57 = vmax.f32 %v532_v51, 0.0  ;;  %1490 = vst [vmem:[%s2041_s25 + $0x49] sm:$0xff] %v600_v53 }
 0x106   : >> { %v611_v56 = vmin.f32 %v595_v50, 6.0  ;;  %v594_v58 = vmax.f32 %v572_v52, 0.0  ;;  %1498 = vst [vmem:[%s2041_s25 + $0xa9] sm:$0xff] %v608_v54  ;;  %359 = sbr.rel (!%p357_p4) target bundleno = 48 (0x30), region = 99 }
 0x107   : >> { %1493 = vst [vmem:[%s2041_s25 + $0x69] sm:$0xff] %v603_v55  ;;  %v602_v59 = vmin.f32 %v586_v57, 6.0 }
 0x108   : >> { %1501 = vst [vmem:[%s2041_s25 + $0xc9] sm:$0xff] %v611_v56  ;;  %v610_v60 = vmin.f32 %v594_v58, 6.0 }
 0x109   : >> { %1492 = vst [vmem:[%s2041_s25 + $0x61] sm:$0xff] %v602_v59 }
 0x10a   : >> { %1500 = vst [vmem:[%s2041_s25 + $0xc1] sm:$0xff] %v610_v60 }
 0x10b LB: >> { %v2744_v19 = vld [vmem:[#allocation19_spill] sm:$0xff]  ;;  %v2745_v18 = vld [vmem:[#allocation18_spill] sm:$0xff]  ;;  %v2746_v17 = vld [vmem:[#allocation17_spill] sm:$0xff]  ;;  %v656_v61 = vlaneseq  ;;  %s1503_s19 = smul.u32 192, %s1826_s17  ;;  %s1613_s21 = sshll.u32 %s1826_s17, 7  ;;  %s1826_s17 = sphi %s2072_s17, %s636_s17  }
 0x10c   : >> { %v2747_v16 = vld [vmem:[#allocation16_spill] sm:$0xff]  ;;  %v2748_v15 = vld [vmem:[#allocation15_spill] sm:$0xff]  ;;  %v2751_v5 = vld [vmem:[#allocation5_spill] sm:$0xff]  ;;  %1689 = vmatprep.subr.mxu0 %v2744_v19  ;;  %1747 = vmatprep.subr.mxu1 %v2744_v19  ;;  %s2621_s22 = scalar_lea.vmem %s1965_s16, %s1613_s21  ;;  %s2626_s23 = scalar_lea.vmem %s1970_s18, %s1613_s21 }
 0x10d   : >> { %v2749_v8 = vld [vmem:[#allocation8_spill] sm:$0xff]  ;;  %v2752_v6 = vld [vmem:[#allocation6_spill] sm:$0xff]  ;;  %v2753_v7 = vld [vmem:[#allocation7_spill] sm:$0xff]  ;;  %1690 = vmatpush3.msra.mxu0 %v2744_v19  ;;  %1763 = vmatpush3.msra.mxu1 %v2744_v19  ;;  %v657_v21 = vshrl.u32 %v656_v61, 7  ;;  %s2090_s20 = scalar_lea.vmem [#allocation2], %s1503_s19  ;;  %s636_s17 = sadd.s32 1, %s1826_s17  }
 0x10e   : >> { %v2750_v2 = vld [vmem:[#allocation4_spill] sm:$0xff]  ;;  %v2754_v9 = vld [vmem:[#allocation9_spill] sm:$0xff]  ;;  %v2755_v14 = vld [vmem:[#allocation14_spill] sm:$0xff]  ;;  %1691 = vmatprep.subr.mxu0 %v2745_v18  ;;  %1748 = vmatprep.subr.mxu1 %v2745_v18  ;;  %p633_p5 = scmp.ge.s32.totalorder %s636_s17, 2  }
 0x10f   : >> { %v2756_v13 = vld [vmem:[#allocation13_spill] sm:$0xff]  ;;  %v2757_v12 = vld [vmem:[#allocation12_spill] sm:$0xff]  ;;  %v2758_v11 = vld [vmem:[#allocation11_spill] sm:$0xff]  ;;  %1692 = vmatpush3.msra.mxu0 %v2745_v18  ;;  %1764 = vmatpush3.msra.mxu1 %v2745_v18  ;;  %v658_v22 = vsub.s32 0, %v657_v21  ;;  %v710_v62 = vsub.s32 1, %v657_v21  ;;  %v762_v63 = vsub.s32 2, %v657_v21 }
 0x110   : >> { %v2759_v10 = vld [vmem:[#allocation10_spill] sm:$0xff]  ;;  %v2760_v0 = vld [vmem:[#allocation3_spill] sm:$0xff]  ;;  %1693 = vmatprep.subr.mxu0 %v2746_v17  ;;  %1749 = vmatprep.subr.mxu1 %v2746_v17  ;;  %v817_v3 = vsub.s32 3, %v657_v21  ;;  %v869_v26 = vsub.s32 4, %v657_v21  ;;  %v921_v27 = vsub.s32 5, %v657_v21  ;;  %v976_v28 = vsub.s32 6, %v657_v21 }
 0x111   : >> { %1694 = vmatpush3.msra.mxu0 %v2746_v17  ;;  %1765 = vmatpush3.msra.mxu1 %v2746_v17  ;;  %v640_v23 = vld [vmem:[%s2090_s20] sm:$0xff]  ;;  %v2098_v29 = vrot.slane %v2760_v0, %v658_v22  ;;  %v2101_v30 = vrot.slane %v2760_v0, %v710_v62  ;;  %v2104_v31 = vrot.slane %v2760_v0, %v762_v63  ;;  %v2107_v32 = vld [vmem:[%s2090_s20 + $0x18] sm:$0xff]  ;;  %v1028_v33 = vsub.s32 7, %v657_v21  ;;  %v2171_v56 = vld [vmem:[%s2090_s20 + $0x30] sm:$0xff] }
 0x112   : >> { %v692_v24 = vld [vmem:[%s2090_s20 + $0x1] sm:$0xff]  ;;  %1695 = vmatprep.subr.mxu0 %v2747_v16  ;;  %1750 = vmatprep.subr.mxu1 %v2747_v16  ;;  %v2112_v34 = vrot.slane %v2760_v0, %v817_v3  ;;  %v2115_v35 = vrot.slane %v2760_v0, %v869_v26  ;;  %v2118_v36 = vrot.slane %v2760_v0, %v921_v27  ;;  %v2138_v44 = vld [vmem:[%s2090_s20 + $0x19] sm:$0xff]  ;;  %v2180_v58 = vld [vmem:[%s2090_s20 + $0x31] sm:$0xff] }
 0x113   : >> { %v744_v25 = vld [vmem:[%s2090_s20 + $0x2] sm:$0xff]  ;;  %1696 = vmatpush3.msra.mxu0 %v2747_v16  ;;  %1766 = vmatpush3.msra.mxu1 %v2747_v16  ;;  %v660_v37 = vmul.f32 %v2098_v29, %v640_v23  ;;  %v712_v38 = vmul.f32 %v2101_v30, %v692_v24  ;;  %v2141_v45 = vrot.slane %v2760_v0, %v976_v28  ;;  %v2150_v48 = vld [vmem:[%s2090_s20 + $0x78] sm:$0xff] }
 0x114   : >> { %1697 = vmatprep.subr.mxu0 %v2748_v15  ;;  %1751 = vmatprep.subr.mxu1 %v2748_v15  ;;  %v764_v39 = vmul.f32 %v2104_v31, %v744_v25  ;;  %v2126_v40 = vld [vmem:[%s2090_s20 + $0x60] sm:$0xff]  ;;  %v819_v42 = vmul.f32 %v2107_v32, %v2112_v34  ;;  %v2144_v46 = vrot.slane %v2760_v0, %v1028_v33  ;;  %v2160_v51 = vld [vmem:[%s2090_s20 + $0x32] sm:$0xff]  ;;  %v641_v22 = vld [vmem:[%s2090_s20 + $0x8] sm:$0xff] }
 0x115   : >> { %v2129_v41 = vld [vmem:[%s2090_s20 + $0x61] sm:$0xff]  ;;  %1698 = vmatpush3.msra.mxu0 %v2748_v15  ;;  %1767 = vmatpush3.msra.mxu1 %v2748_v15  ;;  %v728_v43 = vadd.f32 %v712_v38, %v660_v37  ;;  %v871_v49 = vmul.f32 %v2138_v44, %v2115_v35  ;;  %v668_v52 = vmul.f32 %v2098_v29, %v2126_v40  ;;  %v2187_v21 = vld [vmem:[%s2090_s20 + $0x79] sm:$0xff]  ;;  %v693_v24 = vld [vmem:[%s2090_s20 + $0x9] sm:$0xff] }
 0x116   : >> { %1699 = vmatprep.subr.mxu0 %v2755_v14  ;;  %1752 = vmatprep.subr.mxu1 %v2755_v14  ;;  %v2147_v47 = vld [vmem:[%s2090_s20 + $0x62] sm:$0xff]  ;;  %v2157_v50 = vld [vmem:[%s2090_s20 + $0x1a] sm:$0xff]  ;;  %v720_v53 = vmul.f32 %v2101_v30, %v2129_v41  ;;  %v2175_v57 = vmul.f32 %v1891_v1, %v2160_v51  ;;  %v827_v61 = vmul.f32 %v2150_v48, %v2112_v34  ;;  %v745_v25 = vld [vmem:[%s2090_s20 + $0xa] sm:$0xff] }
 0x117   : >> { %1700 = vmatpush3.msra.mxu0 %v2755_v14  ;;  %1768 = vmatpush3.msra.mxu1 %v2755_v14  ;;  %v780_v54 = vadd.f32 %v764_v39, %v728_v43  ;;  %v923_v55 = vmul.f32 %v2157_v50, %v2118_v36  ;;  %v772_v60 = vmul.f32 %v2104_v31, %v2147_v47  ;;  %v2197_v23 = vld [vmem:[%s2090_s20 + $0x7a] sm:$0xff]  ;;  %v2208_v33 = vld [vmem:[%s2090_s20 + $0x90] sm:$0xff]  ;;  %v2378_v16 = vld [vmem:[%s2090_s20 + $0xa8] sm:$0xff] }
 0x118   : >> { %1701 = vmatprep.subr.mxu0 %v2756_v13  ;;  %1753 = vmatprep.subr.mxu1 %v2756_v13  ;;  %v736_v59 = vadd.f32 %v720_v53, %v668_v52  ;;  %v978_v63 = vmul.f32 %v2171_v56, %v2141_v45  ;;  %v1030_v3 = vmul.f32 %v2180_v58, %v2144_v46  ;;  %v2221_v52 = vld [vmem:[%s2090_s20 + $0x91] sm:$0xff] }
 0x119   : >> { %1702 = vmatpush3.msra.mxu0 %v2756_v13  ;;  %1769 = vmatpush3.msra.mxu1 %v2756_v13  ;;  %v835_v62 = vadd.f32 %v819_v42, %v780_v54  ;;  %2761 = vst [vmem:[#allocation21_spill] sm:$0xff] %v2197_v23  ;;  %v879_v27 = vmul.f32 %v2187_v21, %v2115_v35  ;;  %v2216_v42 = vld [vmem:[%s2090_s20 + $0x20] sm:$0xff]  ;;  %v2224_v53 = vld [vmem:[%s2090_s20 + $0x92] sm:$0xff] }
 0x11a   : >> { %1703 = vmatprep.subr.mxu0 %v2757_v12  ;;  %1754 = vmatprep.subr.mxu1 %v2757_v12  ;;  %v788_v26 = vadd.f32 %v772_v60, %v736_v59  ;;  %v931_v28 = vmul.f32 %v2197_v23, %v2118_v36  ;;  %v986_v38 = vmul.f32 %v2208_v33, %v2141_v45 }
 0x11b   : >> { %1704 = vmatpush3.msra.mxu0 %v2757_v12  ;;  %1770 = vmatpush3.msra.mxu1 %v2757_v12  ;;  %v887_v37 = vadd.f32 %v871_v49, %v835_v62  ;;  %v661_v39 = vmul.f32 %v2098_v29, %v641_v22  ;;  %v713_v49 = vmul.f32 %v2101_v30, %v693_v24  ;;  %v2235_v22 = vld [vmem:[%s2090_s20 + $0x21] sm:$0xff] }
 0x11c   : >> { %1705 = vmatprep.subr.mxu0 %v2758_v11  ;;  %1755 = vmatprep.subr.mxu1 %v2758_v11  ;;  %v843_v43 = vadd.f32 %v827_v61, %v788_v26  ;;  %v765_v54 = vmul.f32 %v2104_v31, %v745_v25  ;;  %v1038_v60 = vmul.f32 %v2221_v52, %v2144_v46  ;;  %v2245_v26 = vld [vmem:[%s2090_s20 + $0x68] sm:$0xff] }
 0x11d   : >> { %1706 = vmatpush3.msra.mxu0 %v2758_v11  ;;  %1771 = vmatpush3.msra.mxu1 %v2758_v11  ;;  %v939_v59 = vadd.f32 %v923_v55, %v887_v37  ;;  %v1090_v61 = vmul.f32 %v1891_v1, %v2224_v53  ;;  %v729_v24 = vadd.f32 %v713_v49, %v661_v39  ;;  %v2242_v55 = vld [vmem:[%s2090_s20 + $0x22] sm:$0xff]  ;;  %v2257_v39 = vld [vmem:[%s2090_s20 + $0x38] sm:$0xff] }
 0x11e   : >> { %1707 = vmatprep.subr.mxu0 %v2759_v10  ;;  %1756 = vmatprep.subr.mxu1 %v2759_v10  ;;  %v895_v62 = vadd.f32 %v879_v27, %v843_v43  ;;  %v820_v25 = vmul.f32 %v2216_v42, %v2112_v34  ;;  %v2248_v37 = vld [vmem:[%s2090_s20 + $0x69] sm:$0xff]  ;;  %v924_v27 = vmul.f32 %v2242_v55, %v2118_v36 }
 0x11f   : >> { %1708 = vmatpush3.msra.mxu0 %v2759_v10  ;;  %1772 = vmatpush3.msra.mxu1 %v2759_v10  ;;  %v994_v0 = vadd.f32 %v978_v63, %v939_v59  ;;  %v872_v10 = vmul.f32 %v2235_v22, %v2115_v35  ;;  %v2260_v43 = vld [vmem:[%s2090_s20 + $0x6a] sm:$0xff]  ;;  %v781_v11 = vadd.f32 %v765_v54, %v729_v24  ;;  %v2267_v59 = vld [vmem:[%s2090_s20 + $0x80] sm:$0xff] }
 0x120   : >> { %1709 = vmatprep.subr.mxu0 %v2754_v9  ;;  %1757 = vmatprep.subr.mxu1 %v2754_v9  ;;  %v947_v49 = vadd.f32 %v931_v28, %v895_v62  ;;  %v979_v63 = vmul.f32 %v2257_v39, %v2141_v45  ;;  %v669_v13 = vmul.f32 %v2098_v29, %v2245_v26 }
 0x121   : >> { %1710 = vmatpush3.msra.mxu0 %v2754_v9  ;;  %1773 = vmatpush3.msra.mxu1 %v2754_v9  ;;  %v1046_v12 = vadd.f32 %v1030_v3, %v994_v0  ;;  %v721_v14 = vmul.f32 %v2101_v30, %v2248_v37  ;;  %v836_v54 = vadd.f32 %v820_v25, %v781_v11  ;;  %v2283_v3 = vld [vmem:[%s2090_s20 + $0x39] sm:$0xff] }
 0x122   : >> { %1711 = vmatprep.subr.mxu0 %v2749_v8  ;;  %1758 = vmatprep.subr.mxu1 %v2749_v8  ;;  %v1002_v28 = vadd.f32 %v986_v38, %v947_v49  ;;  %v773_v62 = vmul.f32 %v2104_v31, %v2260_v43  ;;  %v828_v9 = vmul.f32 %v2267_v59, %v2112_v34  ;;  %v2292_v49 = vld [vmem:[%s2090_s20 + $0x81] sm:$0xff] }
 0x123   : >> { %1712 = vmatpush3.msra.mxu0 %v2749_v8  ;;  %1774 = vmatpush3.msra.mxu1 %v2749_v8  ;;  %v1098_v0 = vadd.f32 %v2175_v57, %v1046_v12  ;;  %v737_v24 = vadd.f32 %v721_v14, %v669_v13  ;;  %v888_v38 = vadd.f32 %v872_v10, %v836_v54  ;;  %v2298_v13 = vld [vmem:[%s2090_s20 + $0x3a] sm:$0xff]  ;;  %v2307_v54 = vld [vmem:[%s2090_s20 + $0x82] sm:$0xff] }
 0x124   : >> { %1713 = vmatprep.subr.mxu0 %v2753_v7  ;;  %1759 = vmatprep.subr.mxu1 %v2753_v7  ;;  %v1054_v11 = vadd.f32 %v1038_v60, %v1002_v28  ;;  %v1031_v25 = vmul.f32 %v2283_v3, %v2144_v46  ;;  %2762 = vst [vmem:[#allocation22_spill] sm:$0xff] %v2292_v49  ;;  %2763 = vst [vmem:[#allocation23_spill] sm:$0xff] %v2307_v54 }
 0x125   : >> { %1714 = vmatpush3.msra.mxu0 %v2753_v7  ;;  %1775 = vmatpush3.msra.mxu1 %v2753_v7  ;;  %v1120_v12 = vadd.f32 %v1901_v4, %v1098_v0  ;;  %v789_v14 = vadd.f32 %v773_v62, %v737_v24  ;;  %v880_v57 = vmul.f32 %v2292_v49, %v2115_v35  ;;  %v2310_v7 = vld [vmem:[%s2090_s20 + $0x98] sm:$0xff] }
 0x126   : >> { %1715 = vmatprep.subr.mxu0 %v2752_v6  ;;  %1760 = vmatprep.subr.mxu1 %v2752_v6  ;;  %v1106_v10 = vadd.f32 %v1090_v61, %v1054_v11  ;;  %v940_v60 = vadd.f32 %v924_v27, %v888_v38  ;;  %v1083_v28 = vmul.f32 %v1891_v1, %v2298_v13 }
 0x127   : >> { %1716 = vmatpush3.msra.mxu0 %v2752_v6  ;;  %1776 = vmatpush3.msra.mxu1 %v2752_v6  ;;  %v1136_v62 = vmax.f32 %v1120_v12, 0.0  ;;  %v844_v0 = vadd.f32 %v828_v9, %v789_v14  ;;  %v932_v24 = vmul.f32 %v2307_v54, %v2118_v36  ;;  %v987_v61 = vmul.f32 %v2310_v7, %v2141_v45 }
 0x128   : >> { %1717 = vmatprep.subr.mxu0 %v2751_v5  ;;  %1761 = vmatprep.subr.mxu1 %v2751_v5  ;;  %v1128_v27 = vadd.f32 %v1901_v4, %v1106_v10  ;;  %v995_v11 = vadd.f32 %v979_v63, %v940_v60  ;;  %v662_v38 = vmul.f32 %v2107_v32, %v2098_v29  ;;  %v2332_v32 = vld [vmem:[%s2090_s20 + $0x99] sm:$0xff] }
 0x129   : >> { %1718 = vmatpush3.msra.mxu0 %v2751_v5  ;;  %1777 = vmatpush3.msra.mxu1 %v2751_v5  ;;  %v1152_v9 = vmin.f32 %v1136_v62, 6.0  ;;  %v896_v12 = vadd.f32 %v880_v57, %v844_v0  ;;  %v714_v14 = vmul.f32 %v2138_v44, %v2101_v30  ;;  %v766_v6 = vmul.f32 %v2157_v50, %v2104_v31  ;;  %v2337_v62 = vld [vmem:[%s2090_s20 + $0x9a] sm:$0xff] }
 0x12a   : >> { %1719 = vmatprep.subr.mxu0 %v2750_v2  ;;  %1762 = vmatprep.subr.mxu1 %v2750_v2  ;;  %v1144_v63 = vmax.f32 %v1128_v27, 0.0  ;;  %v1047_v10 = vadd.f32 %v1031_v25, %v995_v11  ;;  %v1039_v57 = vmul.f32 %v2332_v32, %v2144_v46  ;;  %v821_v50 = vmul.f32 %v2171_v56, %v2112_v34 }
 0x12b   : >> { %1720 = vmatpush3.msra.mxu0 %v2750_v2  ;;  %1778 = vmatpush3.msra.mxu1 %v2750_v2  ;;  %v948_v60 = vadd.f32 %v932_v24, %v896_v12  ;;  %v730_v44 = vadd.f32 %v714_v14, %v662_v38  ;;  %v1091_v25 = vmul.f32 %v1891_v1, %v2337_v62 }
 0x12c   : >> { %1721 = vmatprep.mubr.f32.mxu0 %v1152_v9  ;;  %v1160_v0 = vmin.f32 %v1144_v63, 6.0  ;;  %v1099_v5 = vadd.f32 %v1083_v28, %v1047_v10  ;;  %v873_v27 = vmul.f32 %v2180_v58, %v2115_v35  ;;  %v2346_v9 = vld [vmem:[%s2090_s20 + $0x48] sm:$0xff]  ;;  %v670_v38 = vmul.f32 %v2150_v48, %v2098_v29 }
 0x12d   : >> { %v1003_v24 = vadd.f32 %v987_v61, %v948_v60  ;;  %v782_v11 = vadd.f32 %v766_v6, %v730_v44  ;;  %v722_v12 = vmul.f32 %v2187_v21, %v2101_v30  ;;  %v925_v14 = vmul.f32 %v2160_v51, %v2118_v36  ;;  %v2360_v60 = vld [vmem:[%s2090_s20 + $0x49] sm:$0xff] }
 0x12e   : >> { %1733 = vmatprep.mubr.f32.mxu1 %v1160_v0  ;;  %v1121_v28 = vadd.f32 %v1901_v4, %v1099_v5  ;;  %v980_v63 = vmul.f32 %v2346_v9, %v2141_v45  ;;  %v774_v6 = vmul.f32 %v2197_v23, %v2104_v31  ;;  %v2363_v44 = vld [vmem:[%s2090_s20 + $0x4a] sm:$0xff]  ;;  %v829_v5 = vmul.f32 %v2208_v33, %v2112_v34 }
 0x12f   : >> { %v1055_v61 = vadd.f32 %v1039_v57, %v1003_v24  ;;  %v837_v10 = vadd.f32 %v821_v50, %v782_v11  ;;  %v738_v2 = vadd.f32 %v722_v12, %v670_v38  ;;  %v1032_v8 = vmul.f32 %v2360_v60, %v2144_v46 }
 0x130   : >> { %v1137_v0 = vmax.f32 %v1121_v28, 0.0  ;;  %v1084_v15 = vmul.f32 %v1891_v1, %v2363_v44  ;;  %v881_v57 = vmul.f32 %v2221_v52, %v2115_v35  ;;  %v663_v38 = vmul.f32 %v2216_v42, %v2098_v29  ;;  %v2388_v42 = vld [vmem:[%s2090_s20 + $0xa9] sm:$0xff] }
 0x131   : >> { %v1107_v50 = vadd.f32 %v1091_v25, %v1055_v61  ;;  %v889_v24 = vadd.f32 %v873_v27, %v837_v10  ;;  %v790_v11 = vadd.f32 %v774_v6, %v738_v2  ;;  %v933_v28 = vmul.f32 %v2224_v53, %v2118_v36  ;;  %v2391_v6 = vld [vmem:[%s2090_s20 + $0xaa] sm:$0xff] }
 0x132   : >> { %v1153_v12 = vmin.f32 %v1137_v0, 6.0  ;;  %v715_v17 = vmul.f32 %v2235_v22, %v2101_v30  ;;  %v767_v18 = vmul.f32 %v2242_v55, %v2104_v31  ;;  %v988_v2 = vmul.f32 %v2378_v16, %v2141_v45 }
 0x133   : >> { %v1129_v19 = vadd.f32 %v1901_v4, %v1107_v50  ;;  %v941_v25 = vadd.f32 %v925_v14, %v889_v24  ;;  %v845_v27 = vadd.f32 %v829_v5, %v790_v11  ;;  %v1040_v61 = vmul.f32 %v2388_v42, %v2144_v46 }
 0x134   : >> { %1722 = vmatmul.mubr.f32.vlgmr.msra.gmra.mxu0 %v1153_v12  ;;  %v1092_v22 = vmul.f32 %v1891_v1, %v2391_v6  ;;  %v731_v55 = vadd.f32 %v715_v17, %v663_v38  ;;  %v822_v14 = vmul.f32 %v2257_v39, %v2112_v34  ;;  %v874_v50 = vmul.f32 %v2283_v3, %v2115_v35 }
 0x135   : >> { %v1145_v10 = vmax.f32 %v1129_v19, 0.0  ;;  %v996_v5 = vadd.f32 %v980_v63, %v941_v25  ;;  %v897_v0 = vadd.f32 %v881_v57, %v845_v27  ;;  %v671_v11 = vmul.f32 %v2267_v59, %v2098_v29  ;;  %v2410_v63 = vld [vmem:[%s2090_s20 + $0x50] sm:$0xff] }
 0x136   : >> { %v783_v24 = vadd.f32 %v767_v18, %v731_v55  ;;  %v723_v12 = vmul.f32 %v2292_v49, %v2101_v30  ;;  %v775_v17 = vmul.f32 %v2307_v54, %v2104_v31  ;;  %v926_v19 = vmul.f32 %v2298_v13, %v2118_v36  ;;  %v2415_v25 = vld [vmem:[%s2090_s20 + $0x51] sm:$0xff] }
 0x137   : >> { %v1161_v38 = vmin.f32 %v1145_v10, 6.0  ;;  %v1048_v20 = vadd.f32 %v1032_v8, %v996_v5  ;;  %v949_v23 = vadd.f32 %v933_v28, %v897_v0  ;;  %v981_v18 = vmul.f32 %v2410_v63, %v2141_v45  ;;  %v2418_v27 = vld [vmem:[%s2090_s20 + $0x52] sm:$0xff] }
 0x138   : >> { %v838_v57 = vadd.f32 %v822_v14, %v783_v24  ;;  %v739_v55 = vadd.f32 %v723_v12, %v671_v11  ;;  %v830_v10 = vmul.f32 %v2310_v7, %v2112_v34  ;;  %v1033_v5 = vmul.f32 %v2415_v25, %v2144_v46 }
 0x139   : >> { %1734 = vmatmul.mubr.f32.vlgmr.msra.gmra.mxu1 %v1161_v38  ;;  %v1100_v8 = vadd.f32 %v1084_v15, %v1048_v20  ;;  %v1004_v28 = vadd.f32 %v988_v2, %v949_v23  ;;  %v1085_v14 = vmul.f32 %v1891_v1, %v2418_v27  ;;  %v882_v54 = vmul.f32 %v2332_v32, %v2115_v35  ;;  %v2432_v20 = vld [vmem:[%s2090_s20 + $0xb0] sm:$0xff] }
 0x13a   : >> { %v890_v0 = vadd.f32 %v874_v50, %v838_v57  ;;  %v791_v24 = vadd.f32 %v775_v17, %v739_v55  ;;  %v664_v11 = vmul.f32 %v2171_v56, %v2098_v29  ;;  %v716_v23 = vmul.f32 %v2180_v58, %v2101_v30 }
 0x13b   : >> { %v1122_v12 = vadd.f32 %v1901_v4, %v1100_v8  ;;  %v1056_v15 = vadd.f32 %v1040_v61, %v1004_v28  ;;  %v768_v2 = vmul.f32 %v2160_v51, %v2104_v31  ;;  %v934_v17 = vmul.f32 %v2337_v62, %v2118_v36  ;;  %v2443_v8 = vld [vmem:[%s2090_s20 + $0xb1] sm:$0xff] }
 0x13c   : >> { %v942_v50 = vadd.f32 %v926_v19, %v890_v0  ;;  %v846_v38 = vadd.f32 %v830_v10, %v791_v24  ;;  %v989_v57 = vmul.f32 %v2432_v20, %v2141_v45  ;;  %v2446_v61 = vld [vmem:[%s2090_s20 + $0xb2] sm:$0xff]  ;;  %v732_v28 = vadd.f32 %v716_v23, %v664_v11 }
 0x13d   : >> { %v1138_v56 = vmax.f32 %v1122_v12, 0.0  ;;  %v1108_v55 = vadd.f32 %v1092_v22, %v1056_v15  ;;  %v823_v58 = vmul.f32 %v2346_v9, %v2112_v34  ;;  %v1041_v19 = vmul.f32 %v2443_v8, %v2144_v46 }
 0x13e   : >> { %v997_v49 = vadd.f32 %v981_v18, %v942_v50  ;;  %v898_v51 = vadd.f32 %v882_v54, %v846_v38  ;;  %v1093_v10 = vmul.f32 %v1891_v1, %v2446_v61  ;;  %v784_v22 = vadd.f32 %v768_v2, %v732_v28 }
 0x13f   : >> { %v1154_v0 = vmin.f32 %v1138_v56, 6.0  ;;  %v1130_v24 = vadd.f32 %v1901_v4, %v1108_v55  ;;  %v875_v12 = vmul.f32 %v2360_v60, %v2115_v35  ;;  %v672_v23 = vmul.f32 %v2208_v33, %v2098_v29 }
 0x140   : >> { %v1049_v15 = vadd.f32 %v1033_v5, %v997_v49  ;;  %v950_v11 = vadd.f32 %v934_v17, %v898_v51  ;;  %v724_v54 = vmul.f32 %v2221_v52, %v2101_v30  ;;  %v839_v50 = vadd.f32 %v823_v58, %v784_v22 }
 0x141   : >> { %1724 = vmatprep.mubr.f32.mxu0 %v1154_v0  ;;  %v1146_v18 = vmax.f32 %v1130_v24, 0.0  ;;  %v927_v38 = vmul.f32 %v2363_v44, %v2118_v36  ;;  %v776_v2 = vmul.f32 %v2224_v53, %v2104_v31  ;;  %v831_v49 = vmul.f32 %v2378_v16, %v2112_v34 }
 0x142   : >> { %v1101_v56 = vadd.f32 %v1085_v14, %v1049_v15  ;;  %v1005_v55 = vadd.f32 %v989_v57, %v950_v11  ;;  %v740_v28 = vadd.f32 %v724_v54, %v672_v23  ;;  %v891_v33 = vadd.f32 %v875_v12, %v839_v50 }
 0x143   : >> { %v1162_v5 = vmin.f32 %v1146_v18, 6.0  ;;  %v982_v52 = vmul.f32 %v2141_v45, %v2126_v40  ;;  %v1034_v17 = vmul.f32 %v2144_v46, %v2129_v41  ;;  %v883_v53 = vmul.f32 %v2388_v42, %v2115_v35  ;;  %v2485_v18 = vld [vmem:[%s2090_s20 + $0xc0] sm:$0xff] }
 0x144   : >> { %v1123_v58 = vadd.f32 %v1901_v4, %v1101_v56  ;;  %v1057_v51 = vadd.f32 %v1041_v19, %v1005_v55  ;;  %v792_v0 = vadd.f32 %v776_v2, %v740_v28  ;;  %v943_v14 = vadd.f32 %v927_v38, %v891_v33  ;;  %v2493_v56 = vld [vmem:[%s2090_s20 + $0xc1] sm:$0xff] }
 0x145   : >> { %1736 = vmatprep.mubr.f32.mxu1 %v1162_v5  ;;  %v935_v57 = vmul.f32 %v2391_v6, %v2118_v36  ;;  %v665_v24 = vmul.f32 %v2257_v39, %v2098_v29  ;;  %v717_v22 = vmul.f32 %v2283_v3, %v2101_v30  ;;  %v769_v19 = vmul.f32 %v2298_v13, %v2104_v31 }
 0x146   : >> { %v1139_v12 = vmax.f32 %v1123_v58, 0.0  ;;  %v1109_v15 = vadd.f32 %v1093_v10, %v1057_v51  ;;  %v847_v11 = vadd.f32 %v831_v49, %v792_v0  ;;  %v998_v23 = vadd.f32 %v982_v52, %v943_v14  ;;  %v2504_v0 = vld [vmem:[%s2090_s20 + $0xc2] sm:$0xff] }
 0x147   : >> { %v1086_v54 = vmul.f32 %v1891_v1, %v2147_v47  ;;  %v733_v50 = vadd.f32 %v717_v22, %v665_v24  ;;  %v824_v38 = vmul.f32 %v2410_v63, %v2112_v34  ;;  %v990_v10 = vmul.f32 %v2485_v18, %v2141_v45 }
 0x148   : >> { %v1155_v39 = vmin.f32 %v1139_v12, 6.0  ;;  %v1131_v3 = vadd.f32 %v1901_v4, %v1109_v15  ;;  %v899_v2 = vadd.f32 %v883_v53, %v847_v11  ;;  %v1050_v13 = vadd.f32 %v1034_v17, %v998_v23 }
 0x149   : >> { %v1042_v55 = vmul.f32 %v2493_v56, %v2144_v46  ;;  %v785_v28 = vadd.f32 %v769_v19, %v733_v50  ;;  %v876_v49 = vmul.f32 %v2415_v25, %v2115_v35  ;;  %v928_v52 = vmul.f32 %v2418_v27, %v2118_v36 }
 0x14a   : >> { %1725 = vmatmul.mubr.f32.gmra.mxu0 %v1155_v39  ;;  %v1147_v5 = vmax.f32 %v1131_v3, 0.0  ;;  %v951_v33 = vadd.f32 %v935_v57, %v899_v2  ;;  %v673_v58 = vmul.f32 %v2310_v7, %v2098_v29  ;;  %v1102_v51 = vadd.f32 %v1086_v54, %v1050_v13  ;;  %v2528_v13 = vld [vmem:[%s2090_s20 + $0xc8] sm:$0xff] }
 0x14b   : >> { %v840_v17 = vadd.f32 %v824_v38, %v785_v28  ;;  %v725_v53 = vmul.f32 %v2332_v32, %v2101_v30  ;;  %v777_v14 = vmul.f32 %v2337_v62, %v2104_v31  ;;  %v1094_v57 = vmul.f32 %v1891_v1, %v2504_v0 }
 0x14c   : >> { %v1163_v24 = vmin.f32 %v1147_v5, 6.0  ;;  %v1006_v22 = vadd.f32 %v990_v10, %v951_v33  ;;  %v983_v12 = vmul.f32 %v2141_v45, %v2245_v26  ;;  %v1124_v7 = vadd.f32 %v1901_v4, %v1102_v51 }
 0x14d   : >> { %v892_v15 = vadd.f32 %v876_v49, %v840_v17  ;;  %v741_v11 = vadd.f32 %v725_v53, %v673_v58  ;;  %v832_v19 = vmul.f32 %v2432_v20, %v2112_v34  ;;  %v1035_v62 = vmul.f32 %v2144_v46, %v2248_v37  ;;  %v2537_v58 = vld [vmem:[%s2090_s20 + $0xc9] sm:$0xff] }
 0x14e   : >> { %1737 = vmatmul.mubr.f32.gmra.mxu1 %v1163_v24  ;;  %v1058_v32 = vadd.f32 %v1042_v55, %v1006_v22  ;;  %v1087_v23 = vmul.f32 %v1891_v1, %v2260_v43  ;;  %v884_v54 = vmul.f32 %v2443_v8, %v2115_v35  ;;  %v1140_v50 = vmax.f32 %v1124_v7, 0.0  ;;  %v2543_v17 = vld [vmem:[%s2090_s20 + $0xca] sm:$0xff] }
 0x14f   : >> { %v944_v38 = vadd.f32 %v928_v52, %v892_v15  ;;  %v793_v39 = vadd.f32 %v777_v14, %v741_v11  ;;  %v666_v3 = vmul.f32 %v2346_v9, %v2098_v29  ;;  %v936_v10 = vmul.f32 %v2446_v61, %v2118_v36 }
 0x150   : >> { %v1110_v2 = vadd.f32 %v1094_v57, %v1058_v32  ;;  %v718_v55 = vmul.f32 %v2360_v60, %v2101_v30  ;;  %v770_v28 = vmul.f32 %v2363_v44, %v2104_v31  ;;  %v1156_v49 = vmin.f32 %v1140_v50, 6.0 }
 0x151   : >> { %v999_v5 = vadd.f32 %v983_v12, %v944_v38  ;;  %v848_v33 = vadd.f32 %v832_v19, %v793_v39  ;;  %v991_v52 = vmul.f32 %v2528_v13, %v2141_v45  ;;  %v1043_v51 = vmul.f32 %v2537_v58, %v2144_v46 }
 0x152   : >> { %v1132_v9 = vadd.f32 %v1901_v4, %v1110_v2  ;;  %v734_v53 = vadd.f32 %v718_v55, %v666_v3  ;;  %v825_v60 = vmul.f32 %v2112_v34, %v2126_v40  ;;  %1727 = vmatprep.mubr.f32.mxu0 %v1156_v49  ;;  %v1095_v24 = vmul.f32 %v1891_v1, %v2543_v17  ;;  %v1570_v55 = vld [vmem:[%s2090_s20 + $0xd8] sm:$0xff] }
 0x153   : >> { %v1051_v44 = vadd.f32 %v1035_v62, %v999_v5  ;;  %v900_v14 = vadd.f32 %v884_v54, %v848_v33  ;;  %v877_v22 = vmul.f32 %v2115_v35, %v2129_v41  ;;  %v674_v7 = vmul.f32 %v2378_v16, %v2098_v29 }
 0x154   : >> { %v1148_v57 = vmax.f32 %v1132_v9, 0.0  ;;  %v786_v12 = vadd.f32 %v770_v28, %v734_v53  ;;  %v726_v15 = vmul.f32 %v2388_v42, %v2101_v30  ;;  %v929_v40 = vmul.f32 %v2118_v36, %v2147_v47  ;;  %v1586_v28 = vld [vmem:[%s2090_s20 + $0xd9] sm:$0xff] }
 0x155   : >> { %v1103_v11 = vadd.f32 %v1087_v23, %v1051_v44  ;;  %v952_v19 = vadd.f32 %v936_v10, %v900_v14  ;;  %v778_v32 = vmul.f32 %v2391_v6, %v2104_v31  ;;  %v833_v50 = vmul.f32 %v2485_v18, %v2112_v34  ;;  %v2764_v23 = vld [vmem:[#allocation21_spill] sm:$0xff] }
 0x156   : >> { %v1164_v62 = vmin.f32 %v1148_v57, 6.0  ;;  %v841_v41 = vadd.f32 %v825_v60, %v786_v12  ;;  %v742_v54 = vadd.f32 %v726_v15, %v674_v7  ;;  %v984_v42 = vmul.f32 %v2150_v48, %v2141_v45 }
 0x157   : >> { %v1125_v16 = vadd.f32 %v1901_v4, %v1103_v11  ;;  %v1007_v38 = vadd.f32 %v991_v52, %v952_v19  ;;  %v1036_v47 = vmul.f32 %v2187_v21, %v2144_v46  ;;  %v1088_v39 = vmul.f32 %v1891_v1, %v2764_v23  ;;  %v1602_v52 = vld [vmem:[%s2090_s20 + $0xda] sm:$0xff] }
 0x158   : >> { %1739 = vmatprep.mubr.f32.mxu1 %v1164_v62  ;;  %v893_v6 = vadd.f32 %v877_v22, %v841_v41  ;;  %v794_v3 = vadd.f32 %v778_v32, %v742_v54  ;;  %v885_v2 = vmul.f32 %v2493_v56, %v2115_v35  ;;  %v667_v48 = vmul.f32 %v2410_v63, %v2098_v29 }
 0x159   : >> { %v1141_v18 = vmax.f32 %v1125_v16, 0.0  ;;  %v1059_v10 = vadd.f32 %v1043_v51, %v1007_v38  ;;  %v719_v49 = vmul.f32 %v2415_v25, %v2101_v30  ;;  %v937_v33 = vmul.f32 %v2504_v0, %v2118_v36 }
 0x15a   : >> { %v945_v21 = vadd.f32 %v929_v40, %v893_v6  ;;  %v849_v5 = vadd.f32 %v833_v50, %v794_v3  ;;  %v771_v9 = vmul.f32 %v2418_v27, %v2104_v31  ;;  %v826_v60 = vmul.f32 %v2112_v34, %v2245_v26  ;;  %v2766_v6 = vld [vmem:[#allocation23_spill] sm:$0xff] }
 0x15b   : >> { %v1157_v56 = vmin.f32 %v1141_v18, 6.0  ;;  %v1111_v53 = vadd.f32 %v1095_v24, %v1059_v10  ;;  %v735_v51 = vadd.f32 %v719_v49, %v667_v48  ;;  %v992_v14 = vmul.f32 %v1570_v55, %v2141_v45  ;;  %v1603_v10 = vld [vmem:[%s2090_s20 + $0xe2] sm:$0xff] }
 0x15c   : >> { %v1000_v44 = vadd.f32 %v984_v42, %v945_v21  ;;  %v901_v63 = vadd.f32 %v885_v2, %v849_v5  ;;  %v1044_v25 = vmul.f32 %v1586_v28, %v2144_v46  ;;  %v1096_v0 = vmul.f32 %v1891_v1, %v1602_v52 }
 0x15d   : >> { %1728 = vmatmul.mubr.f32.gmra.mxu0 %v1157_v56  ;;  %v1133_v22 = vadd.f32 %v1901_v4, %v1111_v53  ;;  %v787_v57 = vadd.f32 %v771_v9, %v735_v51  ;;  %v878_v27 = vmul.f32 %v2115_v35, %v2248_v37  ;;  %v675_v26 = vmul.f32 %v2432_v20, %v2098_v29 }
 0x15e   : >> { %v1052_v24 = vadd.f32 %v1036_v47, %v1000_v44  ;;  %v953_v12 = vadd.f32 %v937_v33, %v901_v63  ;;  %v727_v7 = vmul.f32 %v2443_v8, %v2101_v30  ;;  %v930_v19 = vmul.f32 %v2118_v36, %v2260_v43  ;;  %v2767_v44 = vld [vmem:[#allocation20_spill] sm:$0xff] }
 0x15f   : >> { %v1149_v15 = vmax.f32 %v1133_v22, 0.0  ;;  %v842_v11 = vadd.f32 %v826_v60, %v787_v57  ;;  %v779_v40 = vmul.f32 %v2446_v61, %v2104_v31  ;;  %v834_v41 = vmul.f32 %v2528_v13, %v2112_v34  ;;  %v2765_v61 = vld [vmem:[#allocation22_spill] sm:$0xff]  ;;  %v1571_v34 = vld [vmem:[%s2090_s20 + $0xe0] sm:$0xff] }
 0x160   : >> { %v1104_v32 = vadd.f32 %v1088_v39, %v1052_v24  ;;  %v1008_v62 = vadd.f32 %v992_v14, %v953_v12  ;;  %v743_v37 = vadd.f32 %v727_v7, %v675_v26  ;;  %v985_v30 = vmul.f32 %v2267_v59, %v2141_v45  ;;  %v1587_v39 = vld [vmem:[%s2090_s20 + $0xe1] sm:$0xff] }
 0x161   : >> { %v1165_v54 = vmin.f32 %v1149_v15, 6.0  ;;  %v894_v29 = vadd.f32 %v878_v27, %v842_v11  ;;  %v886_v50 = vmul.f32 %v2537_v58, %v2115_v35  ;;  %v1037_v16 = vmul.f32 %v2765_v61, %v2144_v46  ;;  %v1322_v60 = vld [vmem:[%s2621_s22 + $0x8] sm:$0xff]  ;;  %v1329_v7 = vld [vmem:[%s2621_s22 + $0x40] sm:$0xff] }
 0x162   : >> { %v1126_v20 = vadd.f32 %v1901_v4, %v1104_v32  ;;  %v1060_v8 = vadd.f32 %v1044_v25, %v1008_v62  ;;  %v795_v43 = vadd.f32 %v779_v40, %v743_v37  ;;  %v938_v59 = vmul.f32 %v2543_v17, %v2118_v36  ;;  %v1321_v25 = vld [vmem:[%s2621_s22] sm:$0xff]  ;;  %v1330_v27 = vld [vmem:[%s2621_s22 + $0x48] sm:$0xff]  ;;  %v1324_v32 = vld [vmem:[%s2621_s22 + $0x18] sm:$0xff] }
 0x163   : >> { %1740 = vmatmul.mubr.f32.gmra.mxu1 %v1165_v54  ;;  %v946_v31 = vadd.f32 %v930_v19, %v894_v29  ;;  %v1089_v23 = vmul.f32 %v1891_v1, %v2766_v6  ;;  %v993_v2 = vmul.f32 %v1571_v34, %v2141_v45  ;;  %v1045_v48 = vmul.f32 %v1587_v39, %v2144_v46 }
 0x164   : >> { %v1142_v13 = vmax.f32 %v1126_v20, 0.0  ;;  %v1112_v38 = vadd.f32 %v1096_v0, %v1060_v8  ;;  %v850_v42 = vadd.f32 %v834_v41, %v795_v43  ;;  %v1097_v21 = vmul.f32 %v1891_v1, %v1603_v10  ;;  %v1323_v41 = vld [vmem:[%s2621_s22 + $0x10] sm:$0xff]  ;;  %v1332_v20 = vld [vmem:[%s2621_s22 + $0x58] sm:$0xff] }
 0x165   : >> { %v1001_v47 = vadd.f32 %v985_v30, %v946_v31  ;;  %v1331_v31 = vld [vmem:[%s2621_s22 + $0x50] sm:$0xff] }
 0x166   : >> { %v1158_v3 = vmin.f32 %v1142_v13, 6.0  ;;  %v1134_v35 = vadd.f32 %v1901_v4, %v1112_v38  ;;  %v902_v58 = vadd.f32 %v886_v50, %v850_v42  ;;  %v1326_v38 = vld [vmem:[%s2621_s22 + $0x28] sm:$0xff] }
 0x167   : >> { %v1053_v18 = vadd.f32 %v1037_v16, %v1001_v47  ;;  %v1325_v47 = vld [vmem:[%s2621_s22 + $0x20] sm:$0xff] }
 0x168   : >> { %1730 = vmatprep.mubr.f32.mxu0 %v1158_v3  ;;  %v1150_v55 = vmax.f32 %v1134_v35, 0.0  ;;  %v954_v28 = vadd.f32 %v938_v59, %v902_v58  ;;  %v1334_v35 = vld [vmem:[%s2621_s22 + $0x68] sm:$0xff] }
 0x169   : >> { %v1105_v36 = vadd.f32 %v1089_v23, %v1053_v18  ;;  %v1333_v18 = vld [vmem:[%s2621_s22 + $0x60] sm:$0xff] }
 0x16a   : >> { %v1166_v17 = vmin.f32 %v1150_v55, 6.0  ;;  %v1009_v49 = vadd.f32 %v993_v2, %v954_v28 }
 0x16b   : >> { %v1127_v5 = vadd.f32 %v1901_v4, %v1105_v36  ;;  %v1328_v36 = vld [vmem:[%s2621_s22 + $0x38] sm:$0xff] }
 0x16c   : >> { %1742 = vmatprep.mubr.f32.mxu1 %v1166_v17  ;;  %v1061_v33 = vadd.f32 %v1045_v48, %v1009_v49 }
 0x16d   : >> { %v1143_v45 = vmax.f32 %v1127_v5, 0.0 }
 0x16e   : >> { %v1113_v52 = vadd.f32 %v1097_v21, %v1061_v33  ;;  %v1327_v21 = vld [vmem:[%s2621_s22 + $0x30] sm:$0xff] }
 0x16f   : >> { %v1159_v9 = vmin.f32 %v1143_v45, 6.0 }
 0x170   : >> { %v1135_v56 = vadd.f32 %v1901_v4, %v1113_v52  ;;  %v1336_v52 = vld [vmem:[%s2621_s22 + $0x78] sm:$0xff] }
 0x171   : >> { %1731 = vmatmul.mubr.f32.gmra.mxu0 %v1159_v9 }
 0x172   : >> { %v1151_v53 = vmax.f32 %v1135_v56, 0.0 }
 0x174   : >> { %v1167_v46 = vmin.f32 %v1151_v53, 6.0 }
 0x176   : >> { %1743 = vmatmul.mubr.f32.gmra.mxu1 %v1167_v46  ;;  %v1335_v46 = vld [vmem:[%s2621_s22 + $0x70] sm:$0xff] }
 0x1f4   : >> { %v1723_v51 = vpop.f32.mrf.mxu0 }
 0x1f5   : >> { %v1246_v63 = vadd.f32 %v1723_v51, %v2767_v44 }
 0x1f6   : >> { %v1240_v14 = vpop.f32.mrf.mxu0 }
 0x1f7   : >> { %v1338_v22 = vadd.f32 %v1322_v60, %v1246_v63  ;;  %v1241_v0 = vadd.f32 %v2767_v44, %v1240_v14 }
 0x1f9   : >> { %1356 = vst.msk [vmem:[%s2626_s23 + $0x8] sm:$0xff] %vm386_vm0, %v1338_v22  ;;  %v1735_v57 = vpop.f32.mrf.mxu1  ;;  %v1337_v24 = vadd.f32 %v1321_v25, %v1241_v0 }
 0x1fa   : >> { %v1286_v12 = vadd.f32 %v1735_v57, %v2767_v44 }
 0x1fb   : >> { %1355 = vst.msk [vmem:[%s2626_s23] sm:$0xff] %vm386_vm0, %v1337_v24  ;;  %v1280_v26 = vpop.f32.mrf.mxu1 }
 0x1fc   : >> { %v1346_v15 = vadd.f32 %v1330_v27, %v1286_v12  ;;  %v1281_v11 = vadd.f32 %v2767_v44, %v1280_v26 }
 0x1fe   : >> { %1364 = vst.msk [vmem:[%s2626_s23 + $0x48] sm:$0xff] %vm386_vm0, %v1346_v15  ;;  %v1345_v19 = vadd.f32 %v1329_v7, %v1281_v11 }
 0x200   : >> { %1363 = vst.msk [vmem:[%s2626_s23 + $0x40] sm:$0xff] %vm386_vm0, %v1345_v19 }
 0x20a   : >> { %v1726_v40 = vpop.f32.mrf.mxu0 }
 0x20b   : >> { %v1256_v62 = vadd.f32 %v1726_v40, %v2767_v44 }
 0x20c   : >> { %v1250_v37 = vpop.f32.mrf.mxu0 }
 0x20d   : >> { %v1340_v54 = vadd.f32 %v1324_v32, %v1256_v62  ;;  %v1251_v29 = vadd.f32 %v2767_v44, %v1250_v37 }
 0x20e   : >> { %v1738_v30 = vpop.f32.mrf.mxu1 }
 0x20f   : >> { %1358 = vst.msk [vmem:[%s2626_s23 + $0x18] sm:$0xff] %vm386_vm0, %v1340_v54  ;;  %v1296_v8 = vadd.f32 %v1738_v30, %v2767_v44  ;;  %v1339_v43 = vadd.f32 %v1323_v41, %v1251_v29 }
 0x210   : >> { %v1290_v50 = vpop.f32.mrf.mxu1 }
 0x211   : >> { %v1348_v61 = vadd.f32 %v1332_v20, %v1296_v8  ;;  %1357 = vst.msk [vmem:[%s2626_s23 + $0x10] sm:$0xff] %vm386_vm0, %v1339_v43  ;;  %v1291_v16 = vadd.f32 %v2767_v44, %v1290_v50 }
 0x213   : >> { %1366 = vst.msk [vmem:[%s2626_s23 + $0x58] sm:$0xff] %vm386_vm0, %v1348_v61  ;;  %v1347_v34 = vadd.f32 %v1331_v31, %v1291_v16 }
 0x215   : >> { %1365 = vst.msk [vmem:[%s2626_s23 + $0x50] sm:$0xff] %vm386_vm0, %v1347_v34 }
 0x21d   : >> { %v1729_v13 = vpop.f32.mrf.mxu0 }
 0x21e   : >> { %v1266_v42 = vadd.f32 %v1729_v13, %v2767_v44 }
 0x21f   : >> { %v1260_v59 = vpop.f32.mrf.mxu0 }
 0x220   : >> { %v1342_v6 = vadd.f32 %v1326_v38, %v1266_v42  ;;  %v1261_v23 = vadd.f32 %v2767_v44, %v1260_v59 }
 0x222   : >> { %1360 = vst.msk [vmem:[%s2626_s23 + $0x28] sm:$0xff] %vm386_vm0, %v1342_v6  ;;  %v1341_v39 = vadd.f32 %v1325_v47, %v1261_v23 }
 0x223   : >> { %v1741_v3 = vpop.f32.mrf.mxu1 }
 0x224   : >> { %v1306_v58 = vadd.f32 %v1741_v3, %v2767_v44  ;;  %1359 = vst.msk [vmem:[%s2626_s23 + $0x20] sm:$0xff] %vm386_vm0, %v1341_v39 }
 0x225   : >> { %v1300_v2 = vpop.f32.mrf.mxu1 }
 0x226   : >> { %v1350_v10 = vadd.f32 %v1334_v35, %v1306_v58  ;;  %v1301_v55 = vadd.f32 %v2767_v44, %v1300_v2 }
 0x228   : >> { %1368 = vst.msk [vmem:[%s2626_s23 + $0x68] sm:$0xff] %vm386_vm0, %v1350_v10  ;;  %v1349_v28 = vadd.f32 %v1333_v18, %v1301_v55 }
 0x22a   : >> { %1367 = vst.msk [vmem:[%s2626_s23 + $0x60] sm:$0xff] %vm386_vm0, %v1349_v28 }
 0x231   : >> { %v1732_v48 = vpop.f32.mrf.mxu0 }
 0x232   : >> { %v1276_v17 = vadd.f32 %v1732_v48, %v2767_v44 }
 0x233   : >> { %v1270_v49 = vpop.f32.mrf.mxu0 }
 0x234   : >> { %v1344_v5 = vadd.f32 %v1328_v36, %v1276_v17  ;;  %v1271_v33 = vadd.f32 %v2767_v44, %v1270_v49 }
 0x236   : >> { %1362 = vst.msk [vmem:[%s2626_s23 + $0x38] sm:$0xff] %vm386_vm0, %v1344_v5  ;;  %v1744_v45 = vpop.f32.mrf.mxu1  ;;  %v1343_v9 = vadd.f32 %v1327_v21, %v1271_v33 }
 0x237   : >> { %v1316_v56 = vadd.f32 %v1744_v45, %v2767_v44 }
 0x238   : >> { %1361 = vst.msk [vmem:[%s2626_s23 + $0x30] sm:$0xff] %vm386_vm0, %v1343_v9  ;;  %v1310_v53 = vpop.f32.mrf.mxu1 }
 0x239   : >> { %v1352_v51 = vadd.f32 %v1336_v52, %v1316_v56  ;;  %v1311_v60 = vadd.f32 %v2767_v44, %v1310_v53  ;;  %635 = sbr.rel (!%p633_p5) target bundleno = 267 (0x10b), region = 110 }
 0x23b   : >> { %1370 = vst.msk [vmem:[%s2626_s23 + $0x78] sm:$0xff] %vm386_vm0, %v1352_v51  ;;  %v1351_v63 = vadd.f32 %v1335_v46, %v1311_v60 }
 0x23d   : >> { %1369 = vst.msk [vmem:[%s2626_s23 + $0x70] sm:$0xff] %vm386_vm0, %v1351_v63 }
 0x23e PF: > { %s17_s24 = sadd.s32 1, %s1818_s24  }
 0x23f   : > { %p14_p6 = scmp.ge.s32.totalorder %s17_s24, 4  }
 0x241   :  { %16 = sbr.rel (!%p14_p6) target bundleno = 1 (0x1), region = 121 }

</bundles_post_ra>
